<compile_context>
chip_gen: v7x
topology: tpu7x:2x2x1
jax: 0.10.0
libtpu: 0.0.40
codegen_flags: <defaults>
</compile_context>

<pallas_src>
import functools

import jax
import jax.numpy as jnp
from jax.experimental import pallas as pl
from jax.experimental.pallas import tpu as pltpu


def cbam_kernel(x_ref, w1_ref, w2_ref, w3_ref, o_ref, *, H, W, B):
    # x_ref : (B, C, HW) VMEM  lane-dense feature slab for B batch elements
    # w1_ref: (Ch, C)    VMEM  conv1 1x1 weight (C -> C//ratio), no bias
    # w2_ref: (C, Ch)    VMEM  conv2 1x1 weight (C//ratio -> C), no bias
    # w3_ref: (18,)      SMEM  spatial 3x3 weight: [mean taps 0..8 | max taps 0..8]
    # o_ref : (B, C, HW) VMEM  output (also used as stash for the channel-attended slab)
    C = x_ref.shape[1]
    HW = x_ref.shape[2]
    inv_hw = 1.0 / (H * W)          # trace-time reciprocals (no runtime divides)
    inv_c = 1.0 / C

    # ---- phase A: global avg/max pools for every batch element -> (C, 2B) ----
    avg_cols, max_cols = [], []
    for b in range(B):                                   # B is small & static
        xb = x_ref[b].astype(jnp.float32)                # (C, HW)
        avg_cols.append(jnp.sum(xb, axis=1, keepdims=True) * inv_hw)
        max_cols.append(jnp.max(xb, axis=1, keepdims=True))
    pooled = jnp.concatenate(avg_cols + max_cols, axis=1)   # (C, 2B) [avg | max]

    # ---- phase B: shared 1x1-conv MLP on the MXU, batched over 2B pools ----
    w1 = w1_ref[...]                                     # (Ch, C)
    w2 = w2_ref[...]                                     # (C, Ch)
    h = jnp.maximum(
        jnp.dot(w1, pooled, preferred_element_type=jnp.float32,
                precision=jax.lax.Precision.HIGHEST), 0.0)           # (Ch, 2B)
    h_sum = h[:, :B] + h[:, B:]                          # relu(W1@avg)+relu(W1@max)
    att = jnp.dot(w2, h_sum, preferred_element_type=jnp.float32,
                  precision=jax.lax.Precision.HIGHEST)                # (C, B)
    cam = jax.nn.sigmoid(att)                            # (C, B) channel attention

    # ---- phase C: channel-attended slabs (stashed in o_ref) + spatial maps ----
    mean_rows, max_rows = [], []
    for b in range(B):
        x_ch = x_ref[b].astype(jnp.float32) * cam[:, b:b + 1]        # (C, HW)
        o_ref[b] = x_ch.astype(o_ref.dtype)              # stash; rescaled in phase E
        mean_rows.append(jnp.sum(x_ch, axis=0, keepdims=True) * inv_c)
        max_rows.append(jnp.max(x_ch, axis=0, keepdims=True))
    maps = jnp.concatenate(mean_rows + max_rows, axis=0)  # (2B, HW) [mean | max]

    # ---- phase D: 3x3 "same" conv as 9 lane-rolls of the stacked maps ----
    col = jax.lax.broadcasted_iota(jnp.int32, (1, HW), 1)
    if W & (W - 1) == 0:
        xx = jnp.bitwise_and(col, W - 1)                 # col % W without a divide
    else:
        xx = col % W          # TODO(synk): precompute masks host-side for odd W
    ymask = {-1: col >= W, 0: None, 1: col < (H - 1) * W}   # row-validity, no divide
    xmask = {-1: xx >= 1, 0: None, 1: xx <= W - 2}

    # hoist all 18 SMEM scalar reads; per-tap weight column over the 2B rows
    wcols = [
        jnp.concatenate([jnp.full((B, 1), w3_ref[k], jnp.float32),     # mean weight
                         jnp.full((B, 1), w3_ref[9 + k], jnp.float32)],  # max weight
                        axis=0)
        for k in range(9)
    ]

    acc = jnp.zeros((2 * B, HW), jnp.float32)
    for k in range(9):                                   # statically unrolled taps
        dy = k // 3 - 1
        dx = k % 3 - 1
        s = dy * W + dx                                  # flat-layout offset
        rolled = maps if s == 0 else pltpu.roll(maps, shift=(-s) % HW, axis=1)
        tap = rolled * wcols[k]                          # one roll + one mul per tap
        m = ymask[dy]
        if xmask[dx] is not None:
            m = xmask[dx] if m is None else jnp.logical_and(m, xmask[dx])
        if m is not None:
            tap = jnp.where(m, tap, 0.0)                 # zero the padded taps
        acc = acc + tap
    sam = jax.nn.sigmoid(acc[:B] + acc[B:])              # (B, HW) spatial attention

    # ---- phase E: rescale the stashed channel-attended slabs in place ----
    for b in range(B):
        o_ref[b] = (o_ref[b].astype(jnp.float32) * sam[b:b + 1]).astype(o_ref.dtype)


def _min_grid_steps():
    # Chips with 2 TensorCores (v4/v5p megacore, v7x) want >=2 "parallel" grid
    # steps so both cores are fed; 1-TC chips (v5e/v6e) collapse to one step.
    try:
        kind = jax.devices()[0].device_kind.lower()
    except Exception:
        return 1
    return 2 if any(t in kind for t in ("v4", "v5p", "v7", "tpu7")) else 1


def _pick_batch_block(n, min_steps):
    best = 1
    for b in range(1, n + 1):
        if n % b == 0 and n // b >= min_steps:
            best = b
    return best


def cbam_block(x, w1, w2, w3, batch_block=None):
    """x: (N, C, H, W) f32; w1: (C//r, C); w2: (C, C//r); w3: (1, 2, 3, 3)."""
    N, C, H, W = x.shape
    Ch = w1.shape[0]
    HW = H * W
    if batch_block is None:
        batch_block = _pick_batch_block(N, _min_grid_steps())
    B = batch_block
    assert N % B == 0, "batch_block must divide the batch size"

    x2 = x.reshape(N, C, HW)          # lane-dense layout plumbing (outside kernel)
    w3_flat = w3.reshape(-1)          # (18,) SMEM table: [mean taps | max taps]

    out2 = pl.pallas_call(
        functools.partial(cbam_kernel, H=H, W=W, B=B),
        out_shape=jax.ShapeDtypeStruct((N, C, HW), x.dtype),
        grid=(N // B,),
        in_specs=[
            pl.BlockSpec((B, C, HW), lambda n: (n, 0, 0)),
            pl.BlockSpec((Ch, C), lambda n: (0, 0)),
            pl.BlockSpec((C, Ch), lambda n: (0, 0)),
            pl.BlockSpec(memory_space=pltpu.SMEM),
        ],
        out_specs=pl.BlockSpec((B, C, HW), lambda n: (n, 0, 0)),
        compiler_params=pltpu.CompilerParams(dimension_semantics=("parallel",)),
    )(x2, w1, w2, w3_flat)
    return out2.reshape(N, C, H, W)


def cbam_ref(x, w1, w2, w3):
    """Pure-JAX reference matching the PyTorch CBAM_block semantics."""
    mx = jnp.max(x, axis=(2, 3), keepdims=True)
    av = jnp.mean(x, axis=(2, 3), keepdims=True)

    def mlp(p):
        h = jnp.maximum(jnp.einsum('hc,ncij->nhij', w1, p), 0.0)
        return jnp.einsum('ch,nhij->ncij', w2, h)

    cam = jax.nn.sigmoid(mlp(av) + mlp(mx))
    x_ch = cam * x
    c_max = jnp.max(x_ch, axis=1, keepdims=True)
    c_mean = jnp.mean(x_ch, axis=1, keepdims=True)
    cat = jnp.concatenate([c_mean, c_max], axis=1)       # torch cat order: [mean, max]
    sam = jax.lax.conv_general_dilated(
        cat, w3, window_strides=(1, 1), padding='SAME',
        dimension_numbers=('NCHW', 'OIHW', 'NCHW'))
    return jax.nn.sigmoid(sam) * x_ch


if __name__ == "__main__":
    key = jax.random.PRNGKey(0)
    kx, k1, k2, k3 = jax.random.split(key, 4)

    # CBAM_block(in_channal=64, ratio=4) as used inside fra_sig_network.
    N, C, H, W = 2, 64, 16, 16
    ratio = 4
    Ch = C // ratio

    x = jax.random.normal(kx, (N, C, H, W), jnp.float32)
    # conv weights with their 1x1 spatial dims squeezed (all convs are bias=False)
    w1 = jax.random.normal(k1, (Ch, C), jnp.float32) * 0.1       # conv1: C -> C//ratio
    w2 = jax.random.normal(k2, (C, Ch), jnp.float32) * 0.1       # conv2: C//ratio -> C
    w3 = jax.random.normal(k3, (1, 2, 3, 3), jnp.float32) * 0.1  # spatial 3x3, in_ch=2

    out = cbam_block(x, w1, w2, w3)
    out = jax.block_until_ready(out)

    ref = cbam_ref(x, w1, w2, w3)
    assert jnp.allclose(out, ref, atol=2e-5, rtol=1e-5), float(jnp.max(jnp.abs(out - ref)))
    print("KERNEL_OK")
</pallas_src>

<mosaic_0001>
module attributes {stable_mosaic.version = 11 : i64} {
  func.func @cbam_kernel(%arg0: i32, %arg1: memref<2x64x256xf32, #tpu.memory_space<vmem>>, %arg2: memref<16x64xf32, #tpu.memory_space<vmem>>, %arg3: memref<64x16xf32, #tpu.memory_space<vmem>>, %arg4: memref<18xf32, #tpu.memory_space<smem>>, %arg5: memref<2x64x256xf32, #tpu.memory_space<vmem>>) attributes {dimension_semantics = [#tpu.dimension_semantics<parallel>], iteration_bounds = array<i64: 1>, scalar_prefetch = 0 : i64, scratch_operands = 0 : i64, tpu.core_type = #tpu.core_type<tc>, window_params = [{transform_indices = @transform_0, window_bounds = array<i64: 2, 64, 256>}, {pipeline_mode = #tpu.pipeline_mode<synchronous>, transform_indices = @transform_1, window_bounds = array<i64: 16, 64>}, {pipeline_mode = #tpu.pipeline_mode<synchronous>, transform_indices = @transform_2, window_bounds = array<i64: 64, 16>}, {transform_indices = @transform_3, window_bounds = array<i64: 18>}, {transform_indices = @transform_4, window_bounds = array<i64: 2, 64, 256>}]} {
    %c0 = arith.constant 0 : index
    %c0_0 = arith.constant 0 : index
    %c0_1 = arith.constant 0 : index
    %0 = vector.load %arg1[%c0, %c0_0, %c0_1] : memref<2x64x256xf32, #tpu.memory_space<vmem>>, vector<1x64x256xf32>
    %1 = vector.shape_cast %0 : vector<1x64x256xf32> to vector<64x256xf32>
    %cst = arith.constant dense<0.000000e+00> : vector<64xf32>
    %2 = vector.multi_reduction <add>, %1, %cst [1] : vector<64x256xf32> to vector<64xf32>
    %3 = vector.shape_cast %2 : vector<64xf32> to vector<64x1xf32>
    %cst_2 = arith.constant 3.906250e-03 : f32
    %4 = vector.broadcast %cst_2 : f32 to vector<64x1xf32>
    %5 = arith.mulf %3, %4 : vector<64x1xf32>
    %cst_3 = arith.constant dense<0xFF800000> : vector<64xf32>
    %6 = vector.multi_reduction <maximumf>, %1, %cst_3 [1] : vector<64x256xf32> to vector<64xf32>
    %7 = vector.shape_cast %6 : vector<64xf32> to vector<64x1xf32>
    %c1 = arith.constant 1 : index
    %c0_4 = arith.constant 0 : index
    %c0_5 = arith.constant 0 : index
    %8 = vector.load %arg1[%c1, %c0_4, %c0_5] : memref<2x64x256xf32, #tpu.memory_space<vmem>>, vector<1x64x256xf32>
    %9 = vector.shape_cast %8 : vector<1x64x256xf32> to vector<64x256xf32>
    %cst_6 = arith.constant dense<0.000000e+00> : vector<64xf32>
    %10 = vector.multi_reduction <add>, %9, %cst_6 [1] : vector<64x256xf32> to vector<64xf32>
    %11 = vector.shape_cast %10 : vector<64xf32> to vector<64x1xf32>
    %cst_7 = arith.constant 3.906250e-03 : f32
    %12 = vector.broadcast %cst_7 : f32 to vector<64x1xf32>
    %13 = arith.mulf %11, %12 : vector<64x1xf32>
    %cst_8 = arith.constant dense<0xFF800000> : vector<64xf32>
    %14 = vector.multi_reduction <maximumf>, %9, %cst_8 [1] : vector<64x256xf32> to vector<64xf32>
    %15 = vector.shape_cast %14 : vector<64xf32> to vector<64x1xf32>
    %16 = tpu.concatenate %5, %13, %7, %15 in 1 : vector<64x1xf32>, vector<64x1xf32>, vector<64x1xf32>, vector<64x1xf32> -> vector<64x4xf32>
    %c0_9 = arith.constant 0 : index
    %c0_10 = arith.constant 0 : index
    %17 = vector.load %arg2[%c0_9, %c0_10] : memref<16x64xf32, #tpu.memory_space<vmem>>, vector<16x64xf32>
    %c0_11 = arith.constant 0 : index
    %c0_12 = arith.constant 0 : index
    %18 = vector.load %arg3[%c0_11, %c0_12] : memref<64x16xf32, #tpu.memory_space<vmem>>, vector<64x16xf32>
    %cst_13 = arith.constant dense<0.000000e+00> : vector<16x4xf32>
    %19 = tpu.matmul %17, %16, %cst_13 {dimension_numbers = #tpu.dot_dimension_numbers<[1], [0], [0], [1], [0, 0, 1, 1], [], []>, precision = #tpu.contract_precision<fp32>} : vector<16x64xf32>, vector<64x4xf32>, vector<16x4xf32> -> vector<16x4xf32>
    %cst_14 = arith.constant 0.000000e+00 : f32
    %20 = vector.broadcast %cst_14 : f32 to vector<16x4xf32>
    %21 = arith.maximumf %19, %20 : vector<16x4xf32>
    %22 = vector.extract_strided_slice %21 {offsets = [0, 0], sizes = [16, 2], strides = [1, 1]} : vector<16x4xf32> to vector<16x2xf32>
    %23 = vector.extract_strided_slice %21 {offsets = [0, 2], sizes = [16, 2], strides = [1, 1]} : vector<16x4xf32> to vector<16x2xf32>
    %24 = arith.addf %22, %23 : vector<16x2xf32>
    %cst_15 = arith.constant dense<0.000000e+00> : vector<64x2xf32>
    %25 = tpu.matmul %18, %24, %cst_15 {dimension_numbers = #tpu.dot_dimension_numbers<[1], [0], [0], [1], [0, 0, 1, 1], [], []>, precision = #tpu.contract_precision<fp32>} : vector<64x16xf32>, vector<16x2xf32>, vector<64x2xf32> -> vector<64x2xf32>
    %26 = arith.negf %25 : vector<64x2xf32>
    %27 = math.exp %26 : vector<64x2xf32>
    %cst_16 = arith.constant 1.000000e+00 : f32
    %28 = vector.broadcast %cst_16 : f32 to vector<64x2xf32>
    %29 = arith.addf %28, %27 : vector<64x2xf32>
    %30 = arith.divf %28, %29 : vector<64x2xf32>
    %c0_17 = arith.constant 0 : index
    %c0_18 = arith.constant 0 : index
    %c0_19 = arith.constant 0 : index
    %31 = vector.load %arg1[%c0_17, %c0_18, %c0_19] : memref<2x64x256xf32, #tpu.memory_space<vmem>>, vector<1x64x256xf32>
    %32 = vector.shape_cast %31 : vector<1x64x256xf32> to vector<64x256xf32>
    %33 = vector.extract_strided_slice %30 {offsets = [0, 0], sizes = [64, 1], strides = [1, 1]} : vector<64x2xf32> to vector<64x1xf32>
    %34 = vector.broadcast %33 : vector<64x1xf32> to vector<64x256xf32>
    %35 = arith.mulf %32, %34 : vector<64x256xf32>
    %c0_20 = arith.constant 0 : index
    %c0_21 = arith.constant 0 : index
    %c0_22 = arith.constant 0 : index
    %36 = vector.load %arg5[%c0_20, %c0_21, %c0_22] : memref<2x64x256xf32, #tpu.memory_space<vmem>>, vector<1x64x256xf32>
    %37 = vector.shape_cast %36 : vector<1x64x256xf32> to vector<64x256xf32>
    %38 = vector.shape_cast %35 : vector<64x256xf32> to vector<1x64x256xf32>
    tpu.vector_store %arg5[%c0_20, %c0_21, %c0_22], %38 {strides = array<i32>} : memref<2x64x256xf32, #tpu.memory_space<vmem>>, vector<1x64x256xf32>,
    %cst_23 = arith.constant dense<0.000000e+00> : vector<256xf32>
    %39 = vector.multi_reduction <add>, %35, %cst_23 [0] : vector<64x256xf32> to vector<256xf32>
    %40 = vector.shape_cast %39 : vector<256xf32> to vector<1x256xf32>
    %cst_24 = arith.constant 1.562500e-02 : f32
    %41 = vector.broadcast %cst_24 : f32 to vector<1x256xf32>
    %42 = arith.mulf %40, %41 : vector<1x256xf32>
    %cst_25 = arith.constant dense<0xFF800000> : vector<256xf32>
    %43 = vector.multi_reduction <maximumf>, %35, %cst_25 [0] : vector<64x256xf32> to vector<256xf32>
    %44 = vector.shape_cast %43 : vector<256xf32> to vector<1x256xf32>
    %c1_26 = arith.constant 1 : index
    %c0_27 = arith.constant 0 : index
    %c0_28 = arith.constant 0 : index
    %45 = vector.load %arg1[%c1_26, %c0_27, %c0_28] : memref<2x64x256xf32, #tpu.memory_space<vmem>>, vector<1x64x256xf32>
    %46 = vector.shape_cast %45 : vector<1x64x256xf32> to vector<64x256xf32>
    %47 = vector.extract_strided_slice %30 {offsets = [0, 1], sizes = [64, 1], strides = [1, 1]} : vector<64x2xf32> to vector<64x1xf32>
    %48 = vector.broadcast %47 : vector<64x1xf32> to vector<64x256xf32>
    %49 = arith.mulf %46, %48 : vector<64x256xf32>
    %c1_29 = arith.constant 1 : index
    %c0_30 = arith.constant 0 : index
    %c0_31 = arith.constant 0 : index
    %50 = vector.load %arg5[%c1_29, %c0_30, %c0_31] : memref<2x64x256xf32, #tpu.memory_space<vmem>>, vector<1x64x256xf32>
    %51 = vector.shape_cast %50 : vector<1x64x256xf32> to vector<64x256xf32>
    %52 = vector.shape_cast %49 : vector<64x256xf32> to vector<1x64x256xf32>
    tpu.vector_store %arg5[%c1_29, %c0_30, %c0_31], %52 {strides = array<i32>} : memref<2x64x256xf32, #tpu.memory_space<vmem>>, vector<1x64x256xf32>,
    %cst_32 = arith.constant dense<0.000000e+00> : vector<256xf32>
    %53 = vector.multi_reduction <add>, %49, %cst_32 [0] : vector<64x256xf32> to vector<256xf32>
    %54 = vector.shape_cast %53 : vector<256xf32> to vector<1x256xf32>
    %cst_33 = arith.constant 1.562500e-02 : f32
    %55 = vector.broadcast %cst_33 : f32 to vector<1x256xf32>
    %56 = arith.mulf %54, %55 : vector<1x256xf32>
    %cst_34 = arith.constant dense<0xFF800000> : vector<256xf32>
    %57 = vector.multi_reduction <maximumf>, %49, %cst_34 [0] : vector<64x256xf32> to vector<256xf32>
    %58 = vector.shape_cast %57 : vector<256xf32> to vector<1x256xf32>
    %59 = tpu.concatenate %42, %56, %44, %58 in 0 : vector<1x256xf32>, vector<1x256xf32>, vector<1x256xf32>, vector<1x256xf32> -> vector<4x256xf32>
    %60 = tpu.iota {dimensions = array<i32: 1>} : vector<1x256xi32>
    %c15_i32 = arith.constant 15 : i32
    %61 = vector.broadcast %c15_i32 : i32 to vector<1x256xi32>
    %62 = arith.andi %60, %61 : vector<1x256xi32>
    %c16_i32 = arith.constant 16 : i32
    %63 = vector.broadcast %c16_i32 : i32 to vector<1x256xi32>
    %64 = arith.cmpi sge, %60, %63 : vector<1x256xi32>
    %c240_i32 = arith.constant 240 : i32
    %65 = vector.broadcast %c240_i32 : i32 to vector<1x256xi32>
    %66 = arith.cmpi slt, %60, %65 : vector<1x256xi32>
    %c1_i32 = arith.constant 1 : i32
    %67 = vector.broadcast %c1_i32 : i32 to vector<1x256xi32>
    %68 = arith.cmpi sge, %62, %67 : vector<1x256xi32>
    %c14_i32 = arith.constant 14 : i32
    %69 = vector.broadcast %c14_i32 : i32 to vector<1x256xi32>
    %70 = arith.cmpi sle, %62, %69 : vector<1x256xi32>
    %c0_35 = arith.constant 0 : index
    %71 = memref.load %arg4[%c0_35] : memref<18xf32, #tpu.memory_space<smem>>
    %72 = vector.broadcast %71 : f32 to vector<2x1xf32>
    %c9 = arith.constant 9 : index
    %73 = memref.load %arg4[%c9] : memref<18xf32, #tpu.memory_space<smem>>
    %74 = vector.broadcast %73 : f32 to vector<2x1xf32>
    %75 = tpu.concatenate %72, %74 in 0 : vector<2x1xf32>, vector<2x1xf32> -> vector<4x1xf32>
    %c1_36 = arith.constant 1 : index
    %76 = memref.load %arg4[%c1_36] : memref<18xf32, #tpu.memory_space<smem>>
    %77 = vector.broadcast %76 : f32 to vector<2x1xf32>
    %c10 = arith.constant 10 : index
    %78 = memref.load %arg4[%c10] : memref<18xf32, #tpu.memory_space<smem>>
    %79 = vector.broadcast %78 : f32 to vector<2x1xf32>
    %80 = tpu.concatenate %77, %79 in 0 : vector<2x1xf32>, vector<2x1xf32> -> vector<4x1xf32>
    %c2 = arith.constant 2 : index
    %81 = memref.load %arg4[%c2] : memref<18xf32, #tpu.memory_space<smem>>
    %82 = vector.broadcast %81 : f32 to vector<2x1xf32>
    %c11 = arith.constant 11 : index
    %83 = memref.load %arg4[%c11] : memref<18xf32, #tpu.memory_space<smem>>
    %84 = vector.broadcast %83 : f32 to vector<2x1xf32>
    %85 = tpu.concatenate %82, %84 in 0 : vector<2x1xf32>, vector<2x1xf32> -> vector<4x1xf32>
    %c3 = arith.constant 3 : index
    %86 = memref.load %arg4[%c3] : memref<18xf32, #tpu.memory_space<smem>>
    %87 = vector.broadcast %86 : f32 to vector<2x1xf32>
    %c12 = arith.constant 12 : index
    %88 = memref.load %arg4[%c12] : memref<18xf32, #tpu.memory_space<smem>>
    %89 = vector.broadcast %88 : f32 to vector<2x1xf32>
    %90 = tpu.concatenate %87, %89 in 0 : vector<2x1xf32>, vector<2x1xf32> -> vector<4x1xf32>
    %c4 = arith.constant 4 : index
    %91 = memref.load %arg4[%c4] : memref<18xf32, #tpu.memory_space<smem>>
    %92 = vector.broadcast %91 : f32 to vector<2x1xf32>
    %c13 = arith.constant 13 : index
    %93 = memref.load %arg4[%c13] : memref<18xf32, #tpu.memory_space<smem>>
    %94 = vector.broadcast %93 : f32 to vector<2x1xf32>
    %95 = tpu.concatenate %92, %94 in 0 : vector<2x1xf32>, vector<2x1xf32> -> vector<4x1xf32>
    %c5 = arith.constant 5 : index
    %96 = memref.load %arg4[%c5] : memref<18xf32, #tpu.memory_space<smem>>
    %97 = vector.broadcast %96 : f32 to vector<2x1xf32>
    %c14 = arith.constant 14 : index
    %98 = memref.load %arg4[%c14] : memref<18xf32, #tpu.memory_space<smem>>
    %99 = vector.broadcast %98 : f32 to vector<2x1xf32>
    %100 = tpu.concatenate %97, %99 in 0 : vector<2x1xf32>, vector<2x1xf32> -> vector<4x1xf32>
    %c6 = arith.constant 6 : index
    %101 = memref.load %arg4[%c6] : memref<18xf32, #tpu.memory_space<smem>>
    %102 = vector.broadcast %101 : f32 to vector<2x1xf32>
    %c15 = arith.constant 15 : index
    %103 = memref.load %arg4[%c15] : memref<18xf32, #tpu.memory_space<smem>>
    %104 = vector.broadcast %103 : f32 to vector<2x1xf32>
    %105 = tpu.concatenate %102, %104 in 0 : vector<2x1xf32>, vector<2x1xf32> -> vector<4x1xf32>
    %c7 = arith.constant 7 : index
    %106 = memref.load %arg4[%c7] : memref<18xf32, #tpu.memory_space<smem>>
    %107 = vector.broadcast %106 : f32 to vector<2x1xf32>
    %c16 = arith.constant 16 : index
    %108 = memref.load %arg4[%c16] : memref<18xf32, #tpu.memory_space<smem>>
    %109 = vector.broadcast %108 : f32 to vector<2x1xf32>
    %110 = tpu.concatenate %107, %109 in 0 : vector<2x1xf32>, vector<2x1xf32> -> vector<4x1xf32>
    %c8 = arith.constant 8 : index
    %111 = memref.load %arg4[%c8] : memref<18xf32, #tpu.memory_space<smem>>
    %112 = vector.broadcast %111 : f32 to vector<2x1xf32>
    %c17 = arith.constant 17 : index
    %113 = memref.load %arg4[%c17] : memref<18xf32, #tpu.memory_space<smem>>
    %114 = vector.broadcast %113 : f32 to vector<2x1xf32>
    %115 = tpu.concatenate %112, %114 in 0 : vector<2x1xf32>, vector<2x1xf32> -> vector<4x1xf32>
    %cst_37 = arith.constant 0.000000e+00 : f32
    %116 = vector.broadcast %cst_37 : f32 to vector<4x256xf32>
    %c17_i32 = arith.constant 17 : i32
    %117 = tpu.dynamic_rotate %59 by %c17_i32 dim 1 : vector<4x256xf32>, i32 -> vector<4x256xf32>
    %118 = vector.broadcast %75 : vector<4x1xf32> to vector<4x256xf32>
    %119 = arith.mulf %117, %118 : vector<4x256xf32>
    %120 = arith.andi %64, %68 : vector<1x256xi1>
    %cst_38 = arith.constant 0.000000e+00 : f32
    %121 = vector.shape_cast %120 : vector<1x256xi1> to vector<1x256xi1>
    %122 = vector.broadcast %121 : vector<1x256xi1> to vector<4x256xi1>
    %123 = vector.broadcast %cst_38 : f32 to vector<4x256xf32>
    %124 = arith.select %122, %119, %123 : vector<4x256xi1>, vector<4x256xf32>
    %125 = arith.addf %116, %124 : vector<4x256xf32>
    %c16_i32_39 = arith.constant 16 : i32
    %126 = tpu.dynamic_rotate %59 by %c16_i32_39 dim 1 : vector<4x256xf32>, i32 -> vector<4x256xf32>
    %127 = vector.broadcast %80 : vector<4x1xf32> to vector<4x256xf32>
    %128 = arith.mulf %126, %127 : vector<4x256xf32>
    %cst_40 = arith.constant 0.000000e+00 : f32
    %129 = vector.shape_cast %64 : vector<1x256xi1> to vector<1x256xi1>
    %130 = vector.broadcast %129 : vector<1x256xi1> to vector<4x256xi1>
    %131 = vector.broadcast %cst_40 : f32 to vector<4x256xf32>
    %132 = arith.select %130, %128, %131 : vector<4x256xi1>, vector<4x256xf32>
    %133 = arith.addf %125, %132 : vector<4x256xf32>
    %c15_i32_41 = arith.constant 15 : i32
    %134 = tpu.dynamic_rotate %59 by %c15_i32_41 dim 1 : vector<4x256xf32>, i32 -> vector<4x256xf32>
    %135 = vector.broadcast %85 : vector<4x1xf32> to vector<4x256xf32>
    %136 = arith.mulf %134, %135 : vector<4x256xf32>
    %137 = arith.andi %64, %70 : vector<1x256xi1>
    %cst_42 = arith.constant 0.000000e+00 : f32
    %138 = vector.shape_cast %137 : vector<1x256xi1> to vector<1x256xi1>
    %139 = vector.broadcast %138 : vector<1x256xi1> to vector<4x256xi1>
    %140 = vector.broadcast %cst_42 : f32 to vector<4x256xf32>
    %141 = arith.select %139, %136, %140 : vector<4x256xi1>, vector<4x256xf32>
    %142 = arith.addf %133, %141 : vector<4x256xf32>
    %c1_i32_43 = arith.constant 1 : i32
    %143 = tpu.dynamic_rotate %59 by %c1_i32_43 dim 1 : vector<4x256xf32>, i32 -> vector<4x256xf32>
    %144 = vector.broadcast %90 : vector<4x1xf32> to vector<4x256xf32>
    %145 = arith.mulf %143, %144 : vector<4x256xf32>
    %cst_44 = arith.constant 0.000000e+00 : f32
    %146 = vector.shape_cast %68 : vector<1x256xi1> to vector<1x256xi1>
    %147 = vector.broadcast %146 : vector<1x256xi1> to vector<4x256xi1>
    %148 = vector.broadcast %cst_44 : f32 to vector<4x256xf32>
    %149 = arith.select %147, %145, %148 : vector<4x256xi1>, vector<4x256xf32>
    %150 = arith.addf %142, %149 : vector<4x256xf32>
    %151 = vector.broadcast %95 : vector<4x1xf32> to vector<4x256xf32>
    %152 = arith.mulf %59, %151 : vector<4x256xf32>
    %153 = arith.addf %150, %152 : vector<4x256xf32>
    %c255_i32 = arith.constant 255 : i32
    %154 = tpu.dynamic_rotate %59 by %c255_i32 dim 1 : vector<4x256xf32>, i32 -> vector<4x256xf32>
    %155 = vector.broadcast %100 : vector<4x1xf32> to vector<4x256xf32>
    %156 = arith.mulf %154, %155 : vector<4x256xf32>
    %cst_45 = arith.constant 0.000000e+00 : f32
    %157 = vector.shape_cast %70 : vector<1x256xi1> to vector<1x256xi1>
    %158 = vector.broadcast %157 : vector<1x256xi1> to vector<4x256xi1>
    %159 = vector.broadcast %cst_45 : f32 to vector<4x256xf32>
    %160 = arith.select %158, %156, %159 : vector<4x256xi1>, vector<4x256xf32>
    %161 = arith.addf %153, %160 : vector<4x256xf32>
    %c241_i32 = arith.constant 241 : i32
    %162 = tpu.dynamic_rotate %59 by %c241_i32 dim 1 : vector<4x256xf32>, i32 -> vector<4x256xf32>
    %163 = vector.broadcast %105 : vector<4x1xf32> to vector<4x256xf32>
    %164 = arith.mulf %162, %163 : vector<4x256xf32>
    %165 = arith.andi %66, %68 : vector<1x256xi1>
    %cst_46 = arith.constant 0.000000e+00 : f32
    %166 = vector.shape_cast %165 : vector<1x256xi1> to vector<1x256xi1>
    %167 = vector.broadcast %166 : vector<1x256xi1> to vector<4x256xi1>
    %168 = vector.broadcast %cst_46 : f32 to vector<4x256xf32>
    %169 = arith.select %167, %164, %168 : vector<4x256xi1>, vector<4x256xf32>
    %170 = arith.addf %161, %169 : vector<4x256xf32>
    %c240_i32_47 = arith.constant 240 : i32
    %171 = tpu.dynamic_rotate %59 by %c240_i32_47 dim 1 : vector<4x256xf32>, i32 -> vector<4x256xf32>
    %172 = vector.broadcast %110 : vector<4x1xf32> to vector<4x256xf32>
    %173 = arith.mulf %171, %172 : vector<4x256xf32>
    %cst_48 = arith.constant 0.000000e+00 : f32
    %174 = vector.shape_cast %66 : vector<1x256xi1> to vector<1x256xi1>
    %175 = vector.broadcast %174 : vector<1x256xi1> to vector<4x256xi1>
    %176 = vector.broadcast %cst_48 : f32 to vector<4x256xf32>
    %177 = arith.select %175, %173, %176 : vector<4x256xi1>, vector<4x256xf32>
    %178 = arith.addf %170, %177 : vector<4x256xf32>
    %c239_i32 = arith.constant 239 : i32
    %179 = tpu.dynamic_rotate %59 by %c239_i32 dim 1 : vector<4x256xf32>, i32 -> vector<4x256xf32>
    %180 = vector.broadcast %115 : vector<4x1xf32> to vector<4x256xf32>
    %181 = arith.mulf %179, %180 : vector<4x256xf32>
    %182 = arith.andi %66, %70 : vector<1x256xi1>
    %cst_49 = arith.constant 0.000000e+00 : f32
    %183 = vector.shape_cast %182 : vector<1x256xi1> to vector<1x256xi1>
    %184 = vector.broadcast %183 : vector<1x256xi1> to vector<4x256xi1>
    %185 = vector.broadcast %cst_49 : f32 to vector<4x256xf32>
    %186 = arith.select %184, %181, %185 : vector<4x256xi1>, vector<4x256xf32>
    %187 = arith.addf %178, %186 : vector<4x256xf32>
    %188 = vector.extract_strided_slice %187 {offsets = [0, 0], sizes = [2, 256], strides = [1, 1]} : vector<4x256xf32> to vector<2x256xf32>
    %189 = vector.extract_strided_slice %187 {offsets = [2, 0], sizes = [2, 256], strides = [1, 1]} : vector<4x256xf32> to vector<2x256xf32>
    %190 = arith.addf %188, %189 : vector<2x256xf32>
    %191 = arith.negf %190 : vector<2x256xf32>
    %192 = math.exp %191 : vector<2x256xf32>
    %cst_50 = arith.constant 1.000000e+00 : f32
    %193 = vector.broadcast %cst_50 : f32 to vector<2x256xf32>
    %194 = arith.addf %193, %192 : vector<2x256xf32>
    %195 = arith.divf %193, %194 : vector<2x256xf32>
    %c0_51 = arith.constant 0 : index
    %c0_52 = arith.constant 0 : index
    %c0_53 = arith.constant 0 : index
    %196 = vector.load %arg5[%c0_51, %c0_52, %c0_53] : memref<2x64x256xf32, #tpu.memory_space<vmem>>, vector<1x64x256xf32>
    %197 = vector.shape_cast %196 : vector<1x64x256xf32> to vector<64x256xf32>
    %198 = vector.extract_strided_slice %195 {offsets = [0, 0], sizes = [1, 256], strides = [1, 1]} : vector<2x256xf32> to vector<1x256xf32>
    %199 = vector.broadcast %198 : vector<1x256xf32> to vector<64x256xf32>
    %200 = arith.mulf %197, %199 : vector<64x256xf32>
    %c0_54 = arith.constant 0 : index
    %c0_55 = arith.constant 0 : index
    %c0_56 = arith.constant 0 : index
    %201 = vector.load %arg5[%c0_54, %c0_55, %c0_56] : memref<2x64x256xf32, #tpu.memory_space<vmem>>, vector<1x64x256xf32>
    %202 = vector.shape_cast %201 : vector<1x64x256xf32> to vector<64x256xf32>
    %203 = vector.shape_cast %200 : vector<64x256xf32> to vector<1x64x256xf32>
    tpu.vector_store %arg5[%c0_54, %c0_55, %c0_56], %203 {strides = array<i32>} : memref<2x64x256xf32, #tpu.memory_space<vmem>>, vector<1x64x256xf32>,
    %c1_57 = arith.constant 1 : index
    %c0_58 = arith.constant 0 : index
    %c0_59 = arith.constant 0 : index
    %204 = vector.load %arg5[%c1_57, %c0_58, %c0_59] : memref<2x64x256xf32, #tpu.memory_space<vmem>>, vector<1x64x256xf32>
    %205 = vector.shape_cast %204 : vector<1x64x256xf32> to vector<64x256xf32>
    %206 = vector.extract_strided_slice %195 {offsets = [1, 0], sizes = [1, 256], strides = [1, 1]} : vector<2x256xf32> to vector<1x256xf32>
    %207 = vector.broadcast %206 : vector<1x256xf32> to vector<64x256xf32>
    %208 = arith.mulf %205, %207 : vector<64x256xf32>
    %c1_60 = arith.constant 1 : index
    %c0_61 = arith.constant 0 : index
    %c0_62 = arith.constant 0 : index
    %209 = vector.load %arg5[%c1_60, %c0_61, %c0_62] : memref<2x64x256xf32, #tpu.memory_space<vmem>>, vector<1x64x256xf32>
    %210 = vector.shape_cast %209 : vector<1x64x256xf32> to vector<64x256xf32>
    %211 = vector.shape_cast %208 : vector<64x256xf32> to vector<1x64x256xf32>
    tpu.vector_store %arg5[%c1_60, %c0_61, %c0_62], %211 {strides = array<i32>} : memref<2x64x256xf32, #tpu.memory_space<vmem>>, vector<1x64x256xf32>,
    return
  }
  func.func @transform_0(%arg0: i32) -> (i32, i32, i32) {
    %c0_i32 = arith.constant 0 : i32
    %c0_i32_0 = arith.constant 0 : i32
    %c0_i32_1 = arith.constant 0 : i32
    return %arg0, %c0_i32, %c0_i32_0 : i32, i32, i32
  }
  func.func @transform_1(%arg0: i32) -> (i32, i32) {
    %c0_i32 = arith.constant 0 : i32
    %c0_i32_0 = arith.constant 0 : i32
    %c0_i32_1 = arith.constant 0 : i32
    return %c0_i32, %c0_i32_0 : i32, i32
  }
  func.func @transform_2(%arg0: i32) -> (i32, i32) {
    %c0_i32 = arith.constant 0 : i32
    %c0_i32_0 = arith.constant 0 : i32
    %c0_i32_1 = arith.constant 0 : i32
    return %c0_i32, %c0_i32_0 : i32, i32
  }
  func.func @transform_3(%arg0: i32) -> i32 {
    %c0_i32 = arith.constant 0 : i32
    %c0_i32_0 = arith.constant 0 : i32
    return %c0_i32 : i32
  }
  func.func @transform_4(%arg0: i32) -> (i32, i32, i32) {
    %c0_i32 = arith.constant 0 : i32
    %c0_i32_0 = arith.constant 0 : i32
    %c0_i32_1 = arith.constant 0 : i32
    return %arg0, %c0_i32, %c0_i32_0 : i32, i32, i32
  }
}

</mosaic_0001>

<bundles_post_ra>
// kernel: tpu_custom_call.1
= control target key start
LH: loop header
LB: loop body
LE: loop exit
PB: predicated region body
PF: predicated region fallthrough
CT: control target
= control target key end

     0   :  { %9 = vsyncpa [#allocation3], 0  ;;  %s3676_s0 = inlined_call_operand.hbm [shape: f32[2,64,256], index: 0, kind: input, shape index: {}]   ;;  %s3677_s1 = inlined_call_operand.vmem [shape: f32[16,64], index: 1, kind: input, shape index: {}]   ;;  %s3678_s2 = inlined_call_operand.vmem [shape: f32[64,16], index: 2, kind: input, shape index: {}]   ;;  %s3679_s3 = inlined_call_operand.vmem [shape: f32[18], index: 3, kind: input, shape index: {}]   ;;  %s3680_s4 = inlined_call_operand.hbm [shape: f32[2,64,256], index: 4, kind: output, shape index: {}]  }
   0x1   :  { %10 = vsyncpa [#allocation5], 0 }
   0x2   :  { %11 = vsyncpa [#allocation4], 0  ;;  %s2995_s15 = smov [#allocation2]   ;;  %s34_s19 = sshll.u32 %s3679_s3, 4  ;;  %s35_s19 = int_to_ptr.vmem [resolvable:$true] %s34_s19 }
   0x3   :  { %s17_s16 = sshll.u32 %s2995_s15, 4  ;;  %s2933_s22 = scalar_lea.hbm %s3676_s0, 4096  ;;  %s18_s16 = int_to_ptr.vmem [resolvable:$true] %s17_s16 }
   0x4   :  { %p2934_p0 = scmp.ne.s32.totalorder %s3676_s0, %s2933_s22  ;;  %p2937_p1 = scmp.lt.u32.totalorder %s2933_s22, %s3676_s0 }
   0x6   :  { %p2939_p2 = pnand %p2937_p1, %p2934_p0 }
   0x8   :  { %2942 = shalt.err (!%p2939_p2)
}
   0x9   :  { %s2943_s27 = scalar_lea.vmem %s18_s16, 4096  ;;  %p2948_p4 = scmp.lt.s32.totalorder %s18_s16, %s18_s16 }
   0xa   :  { %p2944_p3 = scmp.ne.s32.totalorder %s18_s16, %s2943_s27  ;;  %p2949_p5 = scmp.lt.s32.totalorder %s2943_s27, %s2943_s27 }
   0xc   :  { %p2950_p6 = por %p2949_p5, %p2948_p4 }
   0xe   :  { %p2951_p7 = pnand %p2950_p6, %p2944_p3 }
  0x10   :  { %2954 = shalt.err (!%p2951_p7)
}
  0x11   :  { %s2996_s3 = smov 256   ;;  %s2997_s28 = smov 16  }
  0x12   :  { %23 = dma.hbm_to_vmem [thread:$0]  %s3676_s0, 4096, %s18_s16, [#allocation3], %s2996_s3, %s2996_s3, %s2997_s28  }
  0x13   :  { %s2955_s5 = scalar_lea.vmem %s35_s19, 16  ;;  %p2960_p9 = scmp.lt.s32.totalorder %s35_s19, %s35_s19 }
  0x14   :  { %p2956_p8 = scmp.ne.s32.totalorder %s35_s19, %s2955_s5  ;;  %p2961_p10 = scmp.lt.s32.totalorder %s2955_s5, %s2955_s5 }
  0x16   :  { %p2962_p11 = por %p2961_p10, %p2960_p9 }
  0x18   :  { %p2963_p12 = pnand %p2962_p11, %p2956_p8 }
  0x1a   :  { %2966 = shalt.err (!%p2963_p12)
}
  0x1b   :  { %s2998_s6 = smov [#allocation6]  }
  0x1c   :  { %37 = dma.vmem_to_smem %s35_s19, 16, %s2998_s6, [#allocation5]  }
  0x1d   :  { %2989 = dma.done.wait [#allocation3], 4096  }
  0x1e   :  { %2990 = vsyncadd [#allocation3], 4294963200 }
  0x1f   :  { %2991 = dma.done.wait [#allocation5], 16  }
  0x20   :  { %2992 = vsyncadd [#allocation5], 4294967280 }
  0x21   :  { %44 = sfence }
  0x22   :  { %v118_v0 = vld [vmem:[#allocation2 + $0x80] sm:$0xff]  ;;  %v119_v1 = vld [vmem:[#allocation2 + $0x88] sm:$0xff]  ;;  %v120_v5 = vld [vmem:[#allocation2 + $0x90] sm:$0xff]  ;;  %vm227_vm0 = vcmask 523264   ;;  %vm190_vm1 = vcmask 7168   ;;  %vm199_vm2 = vcmask 15360  }
  0x23   :  { %v45_v2 = vld [vmem:[#allocation2] sm:$0xff]  ;;  %v134_v3 = vadd.f32 %v119_v1, %v118_v0  ;;  %v46_v4 = vld [vmem:[#allocation2 + $0x8] sm:$0xff]  ;;  %v121_v6 = vld [vmem:[#allocation2 + $0x98] sm:$0xff]  ;;  %v166_v27 = vmax.f32 %v118_v0, %v119_v1  ;;  %vm208_vm3 = vcmask 23552   ;;  %vm826_vm4 = vcmask 130048   ;;  %s2999_s11 = smov 126  }
  0x24   :  { %v61_v7 = vadd.f32 %v46_v4, %v45_v2  ;;  %v47_v8 = vld [vmem:[#allocation2 + $0x10] sm:$0xff]  ;;  %v48_v9 = vld [vmem:[#allocation2 + $0x18] sm:$0xff]  ;;  %v137_v10 = vadd.f32 %v121_v6, %v120_v5  ;;  %v93_v13 = vmax.f32 %v45_v2, %v46_v4  ;;  %v49_v16 = vld [vmem:[#allocation2 + $0x20] sm:$0xff]  ;;  %v169_v26 = vmax.f32 %v120_v5, %v121_v6  ;;  %s2340_s26 = sld [smem:[#allocation6 + $0xa]]  ;;  %s2345_s27 = sld [smem:[#allocation6 + $0x4]] }
  0x25   :  { %135 = vadd.xlane.f32.xlu1 %v134_v3  ;;  %v64_v11 = vadd.f32 %v48_v9, %v47_v8  ;;  %v96_v12 = vmax.f32 %v47_v8, %v48_v9  ;;  %v51_v14 = vld [vmem:[#allocation2 + $0x30] sm:$0xff]  ;;  %v52_v15 = vld [vmem:[#allocation2 + $0x38] sm:$0xff]  ;;  %v50_v17 = vld [vmem:[#allocation2 + $0x28] sm:$0xff]  ;;  %s2346_s29 = sld [smem:[#allocation6 + $0xd]]  ;;  %s1942_s30 = sld [smem:[#allocation6]]  ;;  %vm1923_vm5 = vcmask 1041408  }
  0x26   :  { %62 = vadd.xlane.f32.xlu0 %v61_v7  ;;  %v70_v18 = vadd.f32 %v52_v15, %v51_v14  ;;  %v67_v19 = vadd.f32 %v50_v17, %v49_v16  ;;  %v124_v20 = vld [vmem:[#allocation2 + $0xb0] sm:$0xff]  ;;  %v125_v21 = vld [vmem:[#allocation2 + $0xb8] sm:$0xff]  ;;  %v122_v22 = vld [vmem:[#allocation2 + $0xa0] sm:$0xff]  ;;  %v102_v28 = vmax.f32 %v51_v14, %v52_v15  ;;  %v99_v29 = vmax.f32 %v49_v16, %v50_v17  ;;  %s2338_s5 = sld [smem:[#allocation6 + $0x9]]  ;;  %s2349_s6 = sld [smem:[#allocation6 + $0x6]] }
  0x27   :  { %v123_v23 = vld [vmem:[#allocation2 + $0xa8] sm:$0xff]  ;;  %v143_v24 = vadd.f32 %v125_v21, %v124_v20  ;;  %v55_v30 = vld [vmem:[#allocation2 + $0x50] sm:$0xff]  ;;  %v56_v31 = vld [vmem:[#allocation2 + $0x58] sm:$0xff]  ;;  %v175_v42 = vmax.f32 %v124_v20, %v125_v21  ;;  %s2350_s0 = sld [smem:[#allocation6 + $0xf]]  ;;  %s2341_s7 = sld [smem:[#allocation6 + $0x2]]  ;;  %vm1920_vm6 = vcmask 1040384  }
  0x28   :  { %v140_v25 = vadd.f32 %v123_v23, %v122_v22  ;;  %v53_v32 = vld [vmem:[#allocation2 + $0x40] sm:$0xff]  ;;  %v54_v33 = vld [vmem:[#allocation2 + $0x48] sm:$0xff]  ;;  %v76_v34 = vadd.f32 %v56_v31, %v55_v30  ;;  %v128_v36 = vld [vmem:[#allocation2 + $0xd0] sm:$0xff]  ;;  %v172_v43 = vmax.f32 %v122_v22, %v123_v23  ;;  %v108_v44 = vmax.f32 %v55_v30, %v56_v31  ;;  %s2342_s8 = sld [smem:[#allocation6 + $0xb]]  ;;  %s2353_s9 = sld [smem:[#allocation6 + $0x8]] }
  0x29   :  { %138 = vadd.xlane.f32.xlu1 %v137_v10  ;;  %v73_v35 = vadd.f32 %v54_v33, %v53_v32  ;;  %v129_v37 = vld [vmem:[#allocation2 + $0xd8] sm:$0xff]  ;;  %v126_v38 = vld [vmem:[#allocation2 + $0xc0] sm:$0xff]  ;;  %v127_v39 = vld [vmem:[#allocation2 + $0xc8] sm:$0xff]  ;;  %v105_v45 = vmax.f32 %v53_v32, %v54_v33  ;;  %s2343_s10 = sld [smem:[#allocation6 + $0x3]]  ;;  %s2347_s12 = sld [smem:[#allocation6 + $0x5]]  ;;  %vm1926_vm7 = vcmask 1042432  }
  0x2a   :  { %65 = vadd.xlane.f32.xlu0 %v64_v11  ;;  %v149_v40 = vadd.f32 %v129_v37, %v128_v36  ;;  %v146_v41 = vadd.f32 %v127_v39, %v126_v38  ;;  %v59_v46 = vld [vmem:[#allocation2 + $0x70] sm:$0xff]  ;;  %v60_v47 = vld [vmem:[#allocation2 + $0x78] sm:$0xff]  ;;  %v57_v48 = vld [vmem:[#allocation2 + $0x60] sm:$0xff]  ;;  %v181_v58 = vmax.f32 %v128_v36, %v129_v37  ;;  %v178_v59 = vmax.f32 %v126_v38, %v127_v39  ;;  %s2348_s13 = sld [smem:[#allocation6 + $0xe]]  ;;  %s2351_s14 = sld [smem:[#allocation6 + $0x7]] }
  0x2b   :  { %v58_v49 = vld [vmem:[#allocation2 + $0x68] sm:$0xff]  ;;  %v82_v50 = vadd.f32 %v60_v47, %v59_v46  ;;  %v132_v52 = vld [vmem:[#allocation2 + $0xf0] sm:$0xff]  ;;  %v133_v53 = vld [vmem:[#allocation2 + $0xf8] sm:$0xff]  ;;  %v114_v60 = vmax.f32 %v59_v46, %v60_v47  ;;  %s2352_s15 = sld [smem:[#allocation6 + $0x10]]  ;;  %s3002_s16 = smov 17  }
  0x2c   :  { %v79_v51 = vadd.f32 %v58_v49, %v57_v48  ;;  %v130_v54 = vld [vmem:[#allocation2 + $0xe0] sm:$0xff]  ;;  %v131_v55 = vld [vmem:[#allocation2 + $0xe8] sm:$0xff]  ;;  %v155_v56 = vadd.f32 %v133_v53, %v132_v52  ;;  %v111_v61 = vmax.f32 %v57_v48, %v58_v49  ;;  %v187_v62 = vmax.f32 %v132_v52, %v133_v53  ;;  %s3003_s17 = smov 15   ;;  %s3004_s18 = smov 1  }
  0x2d   :  { %97 = vmax.xlane.f32.xlu1 %v96_v12  ;;  %v152_v57 = vadd.f32 %v131_v55, %v130_v54  ;;  %v184_v63 = vmax.f32 %v130_v54, %v131_v55  ;;  %v217_v0 = vld [vmem:[%s3677_s1] sm:$0xff]  ;;  %v218_v55 = vld [vmem:[%s3677_s1 + $0x8] sm:$0xff]  ;;  %s2354_s1 = sld [smem:[#allocation6 + $0x11]]  ;;  %s3005_s19 = smov 127  }
  0x2e   :  { %94 = vmax.xlane.f32.xlu0 %v93_v13  ;;  %v229_v1 = vsel %vm227_vm0, %v217_v0, 0  ;;  %s3006_s20 = smov 113   ;;  %s3007_s21 = smov 112  }
  0x2f   :  { %v3057_v2 = vand.u32 4294901760, %v229_v1  ;;  %s3008_s22 = smov 111   ;;  %s3009_s23 = smov [#allocation7]  }
  0x30   :  { %s2317_s24 = sshll.u32 %s3009_s23, 4  ;;  %s2318_s24 = int_to_ptr.vmem [resolvable:$true] %s2317_s24 }
  0x31   :  { %71 = vadd.xlane.f32.xlu1 %v70_v18  ;;  %v3060_v3 = vsub.f32 %v229_v1, %v3057_v2  ;;  %s2967_s25 = scalar_lea.vmem %s2318_s24, 4096  ;;  %p2972_p0 = scmp.lt.s32.totalorder %s2318_s24, %s2318_s24 }
  0x32   :  { %68 = vadd.xlane.f32.xlu0 %v67_v19  ;;  %p2968_p13 = scmp.ne.s32.totalorder %s2318_s24, %s2967_s25  ;;  %p2973_p1 = scmp.lt.s32.totalorder %s2967_s25, %s2967_s25 }
  0x33   :  { %v309_v4 = vand.u32 4294901760, %v3060_v3 }
  0x34   :  { %p2974_p2 = por %p2973_p1, %p2972_p0 }
  0x35   :  { %144 = vadd.xlane.f32.xlu1 %v143_v24  ;;  %v310_v5 = vsub.f32 %v3060_v3, %v309_v4 }
  0x36   :  { %141 = vadd.xlane.f32.xlu0 %v140_v25  ;;  %p2975_p3 = pnand %p2974_p2, %p2968_p13 }
  0x37   :  { %v311_v6 = vand.u32 4294901760, %v310_v5 }
  0x39   :  { %170 = vmax.xlane.f32.xlu1 %v169_v26  ;;  %2493 = vmatprep.mubr.f32.mxu0 %v311_v6 }
  0x3a   :  { %167 = vmax.xlane.f32.xlu0 %v166_v27 }
  0x3d   :  { %103 = vmax.xlane.f32.xlu1 %v102_v28 }
  0x3e   :  { %100 = vmax.xlane.f32.xlu0 %v99_v29 }
  0x41   :  { %77 = vadd.xlane.f32.xlu1 %v76_v34 }
  0x42   :  { %74 = vadd.xlane.f32.xlu0 %v73_v35 }
  0x45   :  { %150 = vadd.xlane.f32.xlu1 %v149_v40 }
  0x46   :  { %147 = vadd.xlane.f32.xlu0 %v146_v41 }
  0x49   :  { %176 = vmax.xlane.f32.xlu1 %v175_v42 }
  0x4a   :  { %173 = vmax.xlane.f32.xlu0 %v172_v43 }
  0x4d   :  { %109 = vmax.xlane.f32.xlu1 %v108_v44 }
  0x4e   :  { %106 = vmax.xlane.f32.xlu0 %v105_v45 }
  0x51   :  { %83 = vadd.xlane.f32.xlu1 %v82_v50 }
  0x52   :  { %80 = vadd.xlane.f32.xlu0 %v79_v51 }
  0x55   :  { %156 = vadd.xlane.f32.xlu1 %v155_v56 }
  0x56   :  { %153 = vadd.xlane.f32.xlu0 %v152_v57 }
  0x59   :  { %182 = vmax.xlane.f32.xlu1 %v181_v58  ;;  %v232_v58 = vsel %vm227_vm0, %v218_v55, 0 }
  0x5a   :  { %179 = vmax.xlane.f32.xlu0 %v178_v59 }
  0x5d   :  { %115 = vmax.xlane.f32.xlu1 %v114_v60 }
  0x5e   :  { %112 = vmax.xlane.f32.xlu0 %v111_v61 }
  0x61   :  { %188 = vmax.xlane.f32.xlu1 %v187_v62  ;;  %v3090_v62 = vand.u32 4294901760, %v232_v58 }
  0x62   :  { %185 = vmax.xlane.f32.xlu0 %v184_v63 }
  0xb2   :  { %v136_v7 = vpop.xlane.xlu1 %135 }
  0xb3   :  { %v63_v8 = vpop.xlane.xlu0 %62  ;;  %v158_v17 = vmul.f32 0.00390625, %v136_v7 }
  0xb4   :  { %v85_v18 = vmul.f32 0.00390625, %v63_v8 }
  0xb6   :  { %v139_v9 = vpop.xlane.xlu1 %138  ;;  %v191_v23 = vsel %vm190_vm1, %v85_v18, %v158_v17 }
  0xb7   :  { %v66_v10 = vpop.xlane.xlu0 %65  ;;  %v159_v14 = vmul.f32 0.00390625, %v139_v9 }
  0xb8   :  { %v86_v15 = vmul.f32 0.00390625, %v66_v10 }
  0xba   :  { %v98_v11 = vpop.xlane.xlu1 %97  ;;  %v192_v20 = vsel %vm190_vm1, %v86_v15, %v159_v14 }
  0xbb   :  { %v95_v12 = vpop.xlane.xlu0 %94  ;;  %v201_v22 = vsel %vm199_vm2, %v192_v20, %v98_v11  ;;  %v3100_v11 = vsub.f32 %v232_v58, %v3090_v62 }
  0xbc   :  { %v200_v25 = vsel %vm199_vm2, %v191_v23, %v95_v12 }
  0xbe   :  { %v72_v13 = vpop.xlane.xlu1 %71 }
  0xbf   :  { %v69_v16 = vpop.xlane.xlu0 %68  ;;  %v88_v39 = vmul.f32 0.00390625, %v72_v13 }
  0xc0   :  { %v87_v41 = vmul.f32 0.00390625, %v69_v16 }
  0xc2   :  { %v145_v19 = vpop.xlane.xlu1 %144 }
  0xc3   :  { %v142_v21 = vpop.xlane.xlu0 %141  ;;  %v161_v36 = vmul.f32 0.00390625, %v145_v19 }
  0xc4   :  { %v160_v37 = vmul.f32 0.00390625, %v142_v21 }
  0xc5   :  { %v194_v42 = vsel %vm190_vm1, %v88_v39, %v161_v36 }
  0xc6   :  { %v171_v24 = vpop.xlane.xlu1 %170  ;;  %v193_v44 = vsel %vm190_vm1, %v87_v41, %v160_v37 }
  0xc7   :  { %v210_v26 = vsel %vm208_vm3, %v201_v22, %v171_v24  ;;  %v168_v27 = vpop.xlane.xlu0 %167 }
  0xc8   :  { %v238_v28 = vand.u32 4294901760, %v210_v26  ;;  %v209_v29 = vsel %vm208_vm3, %v200_v25, %v168_v27  ;;  %v319_v25 = vand.u32 4294901760, %v3100_v11 }
  0xc9   :  { %v235_v30 = vand.u32 4294901760, %v209_v29 }
  0xca   :  { %v104_v31 = vpop.xlane.xlu1 %103  ;;  %v3092_v63 = vsub.f32 %v210_v26, %v238_v28  ;;  %v320_v41 = vsub.f32 %v3100_v11, %v319_v25 }
  0xcb   :  { %v3072_v32 = vpack.c.bf16 %v238_v28, %v235_v30  ;;  %v101_v33 = vpop.xlane.xlu0 %100  ;;  %v203_v43 = vsel %vm199_vm2, %v194_v42, %v104_v31  ;;  %v3094_v0 = vsub.f32 %v209_v29, %v235_v30 }
  0xcc   :  { %v202_v46 = vsel %vm199_vm2, %v193_v44, %v101_v33  ;;  %v337_v12 = vand.u32 4294901760, %v3092_v63 }
  0xcd   :  { %2688 = vmatprep.subr.bf16.mxu0 %v3072_v32  ;;  %v330_v13 = vand.u32 4294901760, %v3094_v0 }
  0xce   :  { %2690 = vmatpush3.bf16.msra.mxu0 %v3072_v32  ;;  %v78_v34 = vpop.xlane.xlu1 %77  ;;  %v338_v30 = vsub.f32 %v3092_v63, %v337_v12 }
  0xcf   :  { %v75_v35 = vpop.xlane.xlu0 %74  ;;  %v90_v1 = vmul.f32 0.00390625, %v78_v34  ;;  %v331_v29 = vsub.f32 %v3094_v0, %v330_v13 }
  0xd0   :  { %v89_v6 = vmul.f32 0.00390625, %v75_v35 }
  0xd2   :  { %v151_v38 = vpop.xlane.xlu1 %150 }
  0xd3   :  { %v148_v40 = vpop.xlane.xlu0 %147  ;;  %v163_v59 = vmul.f32 0.00390625, %v151_v38 }
  0xd4   :  { %v162_v60 = vmul.f32 0.00390625, %v148_v40 }
  0xd5   :  { %v196_v7 = vsel %vm190_vm1, %v90_v1, %v163_v59  ;;  %v321_v59 = vand.u32 4294901760, %v320_v41  ;;  %v225_v41 = vld [vmem:[%s3678_s2 + $0x30] sm:$0xff] }
  0xd6   :  { %v177_v45 = vpop.xlane.xlu1 %176  ;;  %v195_v9 = vsel %vm190_vm1, %v89_v6, %v162_v60 }
  0xd7   :  { %v212_v47 = vsel %vm208_vm3, %v203_v43, %v177_v45  ;;  %v174_v48 = vpop.xlane.xlu0 %173  ;;  %v332_v45 = vand.u32 4294901760, %v331_v29  ;;  %v221_v29 = vld [vmem:[%s3678_s2 + $0x10] sm:$0xff] }
  0xd8   :  { %v244_v49 = vand.u32 4294901760, %v212_v47  ;;  %v211_v50 = vsel %vm208_vm3, %v202_v46, %v174_v48  ;;  %v339_v46 = vand.u32 4294901760, %v338_v30 }
  0xd9   :  { %v241_v51 = vand.u32 4294901760, %v211_v50 }
  0xda   :  { %v110_v52 = vpop.xlane.xlu1 %109  ;;  %v3106_v17 = vsub.f32 %v212_v47, %v244_v49  ;;  %v2703_v58 = vpack.c.bf16 %v339_v46, %v332_v45  ;;  %v846_v46 = vsel %vm826_vm4, %v225_v41, 0 }
  0xdb   :  { %v3082_v53 = vpack.c.bf16 %v244_v49, %v241_v51  ;;  %v107_v54 = vpop.xlane.xlu0 %106  ;;  %v205_v8 = vsel %vm199_vm2, %v196_v7, %v110_v52  ;;  %v3108_v18 = vsub.f32 %v211_v50, %v241_v51 }
  0xdc   :  { %v204_v14 = vsel %vm199_vm2, %v195_v9, %v107_v54  ;;  %v351_v31 = vand.u32 4294901760, %v3106_v17 }
  0xdd   :  { %2692 = vmatprep.subr.bf16.mxu0 %v3082_v53  ;;  %v344_v33 = vand.u32 4294901760, %v3108_v18 }
  0xde   :  { %2694 = vmatpush3.bf16.msra.mxu0 %v3082_v53  ;;  %v84_v56 = vpop.xlane.xlu1 %83  ;;  %v352_v50 = vsub.f32 %v3106_v17, %v351_v31 }
  0xdf   :  { %v81_v57 = vpop.xlane.xlu0 %80  ;;  %v92_v26 = vmul.f32 0.00390625, %v84_v56  ;;  %v345_v49 = vsub.f32 %v3108_v18, %v344_v33 }
  0xe0   :  { %v91_v34 = vmul.f32 0.00390625, %v81_v57 }
  0xe1   :  { %v346_v60 = vand.u32 4294901760, %v345_v49 }
  0xe2   :  { %v157_v61 = vpop.xlane.xlu1 %156 }
  0xe3   :  { %v154_v5 = vpop.xlane.xlu0 %153  ;;  %v165_v21 = vmul.f32 0.00390625, %v157_v61  ;;  %v353_v61 = vand.u32 4294901760, %v352_v50 }
  0xe4   :  { %v164_v23 = vmul.f32 0.00390625, %v154_v5 }
  0xe5   :  { %v198_v37 = vsel %vm190_vm1, %v92_v26, %v165_v21 }
  0xe6   :  { %v183_v10 = vpop.xlane.xlu1 %182  ;;  %v197_v39 = vsel %vm190_vm1, %v91_v34, %v164_v23  ;;  %v2723_v23 = vpack.c.bf16 %v3106_v17, %v3108_v18 }
  0xe7   :  { %v214_v15 = vsel %vm208_vm3, %v205_v8, %v183_v10  ;;  %v180_v16 = vpop.xlane.xlu0 %179  ;;  %v2707_v8 = vpack.c.bf16 %v353_v61, %v346_v60 }
  0xe8   :  { %v250_v19 = vand.u32 4294901760, %v214_v15  ;;  %v213_v20 = vsel %vm208_vm3, %v204_v14, %v180_v16 }
  0xe9   :  { %v247_v22 = vand.u32 4294901760, %v213_v20 }
  0xea   :  { %v116_v24 = vpop.xlane.xlu1 %115  ;;  %v3122_v35 = vsub.f32 %v214_v15, %v250_v19 }
  0xeb   :  { %v3112_v27 = vpack.c.bf16 %v250_v19, %v247_v22  ;;  %v113_v28 = vpop.xlane.xlu0 %112  ;;  %v3124_v36 = vsub.f32 %v213_v20, %v247_v22  ;;  %v207_v38 = vsel %vm199_vm2, %v198_v37, %v116_v24  ;;  %v2719_v22 = vpack.c.bf16 %v3092_v63, %v3094_v0 }
  0xec   :  { %v206_v42 = vsel %vm199_vm2, %v197_v39, %v113_v28  ;;  %v365_v51 = vand.u32 4294901760, %v3122_v35  ;;  %v2751_v28 = vpack.c.bf16 %v337_v12, %v330_v13  ;;  %v224_v39 = vld [vmem:[%s3678_s2 + $0x28] sm:$0xff] }
  0xed   :  { %2696 = vmatprep.subr.bf16.mxu0 %v3112_v27  ;;  %v358_v52 = vand.u32 4294901760, %v3124_v36  ;;  %v2727_v24 = vpack.c.bf16 %v3122_v35, %v3124_v36  ;;  %v843_v45 = vsel %vm826_vm4, %v224_v39, 0 }
  0xee   :  { %2698 = vmatpush3.bf16.msra.mxu0 %v3112_v27  ;;  %v189_v40 = vpop.xlane.xlu1 %188  ;;  %v366_v7 = vsub.f32 %v3122_v35, %v365_v51  ;;  %v223_v35 = vld [vmem:[%s3678_s2 + $0x20] sm:$0xff] }
  0xef   :  { %v216_v43 = vsel %vm208_vm3, %v207_v38, %v189_v40  ;;  %v186_v44 = vpop.xlane.xlu0 %185  ;;  %v359_v6 = vsub.f32 %v3124_v36, %v358_v52  ;;  %v840_v38 = vsel %vm826_vm4, %v223_v35, 0 }
  0xf0   :  { %v256_v47 = vand.u32 4294901760, %v216_v43  ;;  %v215_v48 = vsel %vm208_vm3, %v206_v42, %v186_v44  ;;  %v367_v10 = vand.u32 4294901760, %v366_v7  ;;  %v3258_v44 = vand.u32 4294901760, %v840_v38 }
  0xf1   :  { %v253_v54 = vand.u32 4294901760, %v215_v48  ;;  %v360_v9 = vand.u32 4294901760, %v359_v6 }
  0xf2   :  { %v3145_v55 = vsub.f32 %v216_v43, %v256_v47 }
  0xf3   :  { %v3147_v56 = vpack.c.bf16 %v256_v47, %v253_v54  ;;  %v3149_v57 = vsub.f32 %v215_v48, %v253_v54  ;;  %v2711_v16 = vpack.c.bf16 %v367_v10, %v360_v9  ;;  %v226_v47 = vld [vmem:[%s3678_s2 + $0x38] sm:$0xff] }
  0xf4   :  { %v379_v1 = vand.u32 4294901760, %v3145_v55 }
  0xf5   :  { %v372_v5 = vand.u32 4294901760, %v3149_v57  ;;  %2700 = vmatprep.subr.bf16.mxu0 %v3147_v56  ;;  %v2731_v26 = vpack.c.bf16 %v3145_v55, %v3149_v57 }
  0xf6   :  { %2702 = vmatpush3.bf16.msra.mxu0 %v3147_v56  ;;  %v380_v15 = vsub.f32 %v3145_v55, %v379_v1 }
  0xf7   :  { %2704 = vmatprep.subr.bf16.mxu0 %v2703_v58  ;;  %v373_v14 = vsub.f32 %v3149_v57, %v372_v5  ;;  %v2763_v63 = vpack.c.bf16 %v379_v1, %v372_v5  ;;  %v3275_v57 = vand.u32 4294901760, %v846_v46 }
  0xf8   :  { %v381_v20 = vand.u32 4294901760, %v380_v15 }
  0xf9   :  { %2494 = vmatmul.mubr.f32.vlgmr.msra.gmra.mrb[0].mxu0 %v321_v59  ;;  %v374_v19 = vand.u32 4294901760, %v373_v14  ;;  %v3292_v14 = vsub.f32 %v846_v46, %v3275_v57 }
  0xfa   :  { %2706 = vmatpush3.bf16.msra.mxu0 %v2703_v58  ;;  %2512 = vmatprep.mubr.f32.mxu0 %v3057_v2  ;;  %v849_v58 = vsel %vm826_vm4, %v226_v47, 0 }
  0xfb   :  { %2708 = vmatprep.subr.bf16.mxu0 %v2707_v8  ;;  %v2715_v21 = vpack.c.bf16 %v381_v20, %v374_v19  ;;  %v3285_v7 = vand.u32 4294901760, %v849_v58 }
  0xfe   :  { %2710 = vmatpush3.bf16.msra.mxu0 %v2707_v8 }
  0xff   :  { %2712 = vmatprep.subr.bf16.mxu0 %v2711_v16 }
 0x102   :  { %2714 = vmatpush3.bf16.msra.mxu0 %v2711_v16 }
 0x103   :  { %2716 = vmatprep.subr.bf16.mxu0 %v2715_v21 }
 0x106   :  { %2718 = vmatpush3.bf16.msra.mxu0 %v2715_v21 }
 0x107   :  { %2720 = vmatprep.subr.bf16.mxu0 %v2719_v22 }
 0x109   :  { %2513 = vmatmul.mubr.f32.vlgmr.msra.gmra.mrb[0].mxu0 %v3090_v62 }
 0x10a   :  { %2722 = vmatpush3.bf16.msra.mxu0 %v2719_v22  ;;  %2531 = vmatprep.mubr.f32.mxu0 %v3060_v3  ;;  %v2755_v3 = vpack.c.bf16 %v351_v31, %v344_v33  ;;  %v834_v31 = vsel %vm826_vm4, %v221_v29, 0  ;;  %v222_v33 = vld [vmem:[%s3678_s2 + $0x18] sm:$0xff] }
 0x10b   :  { %2724 = vmatprep.subr.bf16.mxu0 %v2723_v23  ;;  %v3240_v36 = vand.u32 4294901760, %v834_v31  ;;  %v837_v37 = vsel %vm826_vm4, %v222_v33, 0 }
 0x10c   :  { %v3256_v43 = vand.u32 4294901760, %v837_v37 }
 0x10d   :  { %v3254_v42 = vsub.f32 %v834_v31, %v3240_v36 }
 0x10e   :  { %2726 = vmatpush3.bf16.msra.mxu0 %v2723_v23 }
 0x10f   :  { %2728 = vmatprep.subr.bf16.mxu0 %v2727_v24  ;;  %v940_v50 = vand.u32 4294901760, %v3254_v42 }
 0x111   :  { %v941_v9 = vsub.f32 %v3254_v42, %v940_v50 }
 0x112   :  { %2730 = vmatpush3.bf16.msra.mxu0 %v2727_v24  ;;  %v989_v24 = vsub.f32 %v849_v58, %v3285_v7 }
 0x113   :  { %2732 = vmatprep.subr.bf16.mxu0 %v2731_v26 }
 0x116   :  { %2734 = vmatpush3.bf16.msra.mxu0 %v2731_v26  ;;  %v942_v26 = vand.u32 4294901760, %v941_v9 }
 0x117   :  { %2736 = vmatprep.subr.bf16.mxu0 %v3072_v32 }
 0x119   :  { %2532 = vmatmul.mubr.f32.vlgmr.msra.gmra.mrb[0].mxu0 %v3100_v11 }
 0x11a   :  { %2738 = vmatpush3.bf16.msra.mxu0 %v3072_v32  ;;  %2550 = vmatprep.mubr.f32.mxu0 %v309_v4  ;;  %v2759_v4 = vpack.c.bf16 %v365_v51, %v358_v52  ;;  %v3268_v51 = vsub.f32 %v837_v37, %v3256_v43  ;;  %v3270_v52 = vand.u32 4294901760, %v843_v45 }
 0x11b   :  { %2740 = vmatprep.subr.bf16.mxu0 %v3082_v53 }
 0x11c   :  { %v950_v5 = vand.u32 4294901760, %v3268_v51  ;;  %v3283_v6 = vsub.f32 %v843_v45, %v3270_v52 }
 0x11e   :  { %2742 = vmatpush3.bf16.msra.mxu0 %v3082_v53  ;;  %v951_v22 = vsub.f32 %v3268_v51, %v950_v5  ;;  %v970_v23 = vand.u32 4294901760, %v3283_v6 }
 0x11f   :  { %2744 = vmatprep.subr.bf16.mxu0 %v3112_v27 }
 0x122   :  { %2746 = vmatpush3.bf16.msra.mxu0 %v3112_v27 }
 0x123   :  { %2748 = vmatprep.subr.bf16.mxu0 %v3147_v56 }
 0x126   :  { %2750 = vmatpush3.bf16.msra.mxu0 %v3147_v56 }
 0x127   :  { %2752 = vmatprep.subr.bf16.mxu0 %v2751_v28 }
 0x129   :  { %2551 = vmatmul.mubr.f32.vlgmr.msra.gmra.mrb[0].mxu0 %v319_v25 }
 0x12a   :  { %2754 = vmatpush3.bf16.msra.mxu0 %v2751_v28  ;;  %2569 = vmatprep.mubr.f32.mxu0 %v3057_v2 }
 0x12b   :  { %2756 = vmatprep.subr.bf16.mxu0 %v2755_v3 }
 0x12e   :  { %2758 = vmatpush3.bf16.msra.mxu0 %v2755_v3 }
 0x12f   :  { %2760 = vmatprep.subr.bf16.mxu0 %v2759_v4 }
 0x132   :  { %2762 = vmatpush3.bf16.msra.mxu0 %v2759_v4  ;;  %v980_v4 = vand.u32 4294901760, %v3292_v14 }
 0x133   :  { %2764 = vmatprep.subr.bf16.mxu0 %v2763_v63 }
 0x136   :  { %2766 = vmatpush3.bf16.msra.mxu0 %v2763_v63 }
 0x137   :  { %2768 = vmatprep.subr.bf16.mxu0 %v3072_v32 }
 0x139   :  { %2570 = vmatmul.mubr.f32.vlgmr.msra.gmra.mrb[0].mxu0 %v3090_v62 }
 0x13a   :  { %2770 = vmatpush3.bf16.msra.mxu0 %v3072_v32  ;;  %2588 = vmatprep.mubr.f32.mxu0 %v3057_v2  ;;  %v219_v32 = vld [vmem:[%s3678_s2] sm:$0xff] }
 0x13b   :  { %2772 = vmatprep.subr.bf16.mxu0 %v3082_v53  ;;  %v828_v2 = vsel %vm826_vm4, %v219_v32, 0 }
 0x13c   :  { %v3215_v0 = vand.u32 4294901760, %v828_v2 }
 0x13e   :  { %2774 = vmatpush3.bf16.msra.mxu0 %v3082_v53  ;;  %v3218_v53 = vsub.f32 %v828_v2, %v3215_v0  ;;  %v952_v2 = vand.u32 4294901760, %v951_v22 }
 0x13f   :  { %2776 = vmatprep.subr.bf16.mxu0 %v3112_v27 }
 0x140   :  { %v920_v11 = vand.u32 4294901760, %v3218_v53 }
 0x142   :  { %2778 = vmatpush3.bf16.msra.mxu0 %v3112_v27  ;;  %v921_v12 = vsub.f32 %v3218_v53, %v920_v11  ;;  %v220_v27 = vld [vmem:[%s3678_s2 + $0x8] sm:$0xff]  ;;  %s2339_s2 = sld [smem:[#allocation6 + $0x1]] }
 0x143   :  { %2780 = vmatprep.subr.bf16.mxu0 %v3147_v56  ;;  %v831_v30 = vsel %vm826_vm4, %v220_v27, 0 }
 0x144   :  { %v922_v13 = vand.u32 4294901760, %v921_v12  ;;  %v3235_v34 = vand.u32 4294901760, %v831_v30 }
 0x146   :  { %2782 = vmatpush3.bf16.msra.mxu0 %v3147_v56  ;;  %2595 = vmatprep.mubr.f32.mxu1 %v922_v13  ;;  %v3248_v40 = vsub.f32 %v831_v30, %v3235_v34  ;;  %v3273_v56 = vsub.f32 %v840_v38, %v3258_v44  ;;  %v971_v13 = vsub.f32 %v3283_v6, %v970_v23 }
 0x148   :  { %v930_v48 = vand.u32 4294901760, %v3248_v40  ;;  %v960_v10 = vand.u32 4294901760, %v3273_v56  ;;  %v972_v29 = vand.u32 4294901760, %v971_v13  ;;  %v1948_v22 = vstv %s2339_s2 }
 0x149   :  { %2589 = vmatmul.mubr.f32.vlgmr.msra.gmra.mrb[0].mxu0 %v3090_v62 }
 0x14a   :  { %v931_v61 = vsub.f32 %v3248_v40, %v930_v48  ;;  %v961_v3 = vsub.f32 %v3273_v56, %v960_v10 }
 0x14c   :  { %v932_v20 = vand.u32 4294901760, %v931_v61 }
 0x21c   :  { %v2590_v62 = vpop.f32.mrb[0].mxu0 }
 0x21d   :  { %v815_v17 = vmax.f32 %v2590_v62, 0.0  ;;  %v804_v18 = vpop.f32.mrb[1].mxu0  ;;  %v990_v62 = vand.u32 4294901760, %v989_v24 }
 0x21e   :  { %v814_v25 = vmax.f32 %v804_v18, 0.0  ;;  %v981_v18 = vsub.f32 %v3292_v14, %v980_v4 }
 0x21f   :  { %820 = vrot.lane.b32.xlu1 %v815_v17, %s2999_s11  ;;  %v991_v30 = vsub.f32 %v989_v24, %v990_v62 }
 0x220   :  { %818 = vrot.lane.b32.xlu0 %v814_v25, %s2999_s11  ;;  %v982_v31 = vand.u32 4294901760, %v981_v18  ;;  %s2344_s11 = sld [smem:[#allocation6 + $0xc]]  ;;  %v1983_v18 = vstv %s2353_s9 }
 0x221   :  { %v992_v33 = vand.u32 4294901760, %v991_v30  ;;  %v1958_v30 = vstv %s2343_s10 }
 0x291   :  { %v821_v49 = vpop.permute.xlu1 %820 }
 0x292   :  { %v825_v54 = vadd.f32 %v821_v49, %v815_v17  ;;  %v819_v55 = vpop.permute.xlu0 %818  ;;  %v962_v17 = vand.u32 4294901760, %v961_v3 }
 0x293   :  { %v824_v59 = vadd.f32 %v819_v55, %v814_v25 }
 0x294   :  { %v855_v60 = vand.u32 4294901760, %v825_v54 }
 0x295   :  { %v852_v1 = vand.u32 4294901760, %v824_v59 }
 0x296   :  { %v1007_v8 = vsub.f32 %v825_v54, %v855_v60 }
 0x297   :  { %v3294_v15 = vpack.c.bf16 %v855_v60, %v852_v1  ;;  %v1000_v16 = vsub.f32 %v824_v59, %v852_v1 }
 0x298   :  { %v1008_v19 = vand.u32 4294901760, %v1007_v8 }
 0x299   :  { %v1001_v21 = vand.u32 4294901760, %v1000_v16  ;;  %2784 = vmatprep.subr.bf16.mxu1 %v3294_v15  ;;  %v2791_v27 = vpack.c.bf16 %v1007_v8, %v1000_v16 }
 0x29a   :  { %2786 = vmatpush3.bf16.msra.mxu1 %v3294_v15  ;;  %v1009_v28 = vsub.f32 %v1007_v8, %v1008_v19 }
 0x29b   :  { %v1002_v63 = vsub.f32 %v1000_v16, %v1001_v21  ;;  %v2799_v35 = vpack.c.bf16 %v1008_v19, %v1001_v21 }
 0x29c   :  { %v1010_v32 = vand.u32 4294901760, %v1009_v28  ;;  %v1965_v28 = vstv %s2346_s29 }
 0x29d   :  { %2596 = vmatmul.mubr.f32.vlgmr.msra.gmra.mrb[0].mxu1 %v932_v20  ;;  %v1003_v12 = vand.u32 4294901760, %v1002_v63  ;;  %v1945_v63 = vstv %s2338_s5 }
 0x29e   :  { %2598 = vmatprep.mubr.f32.mxu1 %v942_v26  ;;  %v1963_v26 = vstv %s2345_s27 }
 0x29f   :  { %v2787_v25 = vpack.c.bf16 %v1010_v32, %v1003_v12  ;;  %v1966_v3 = vsel %vm1923_vm5, %v1963_v26, %v1965_v28  ;;  %v1973_v32 = vstv %s2349_s6 }
 0x2a1   :  { %2599 = vmatmul.mubr.f32.gmra.mrb[2].mxu1 %v952_v2  ;;  %2788 = vmatprep.subr.bf16.mxu1 %v2787_v25  ;;  %v1975_v2 = vstv %s2350_s0 }
 0x2a2   :  { %2790 = vmatpush3.bf16.msra.mxu1 %v2787_v25  ;;  %2601 = vmatprep.mubr.f32.mxu1 %v962_v17  ;;  %v1976_v13 = vsel %vm1923_vm5, %v1973_v32, %v1975_v2  ;;  %v1955_v17 = vstv %s2342_s8  ;;  %v1985_v25 = vstv %s2354_s1 }
 0x2a3   :  { %2792 = vmatprep.subr.bf16.mxu1 %v2791_v27 }
 0x2a5   :  { %2602 = vmatmul.mubr.f32.gmra.mrb[4].mxu1 %v972_v29  ;;  %v1986_v29 = vsel %vm1923_vm5, %v1983_v18, %v1985_v25  ;;  %v2921_v25 = vld [vmem:[#allocation2 + $0x20] sm:$0xff] }
 0x2a6   :  { %2604 = vmatprep.mubr.f32.mxu1 %v982_v31  ;;  %v1960_v31 = vstv %s2344_s11 }
 0x2a9   :  { %2605 = vmatmul.mubr.f32.gmra.mrb[6].mxu1 %v992_v33  ;;  %v1961_v33 = vsel %vm1923_vm5, %v1958_v30, %v1960_v31  ;;  %v1797_v31 = vld [vmem:[#allocation2 + $0xe0] sm:$0xff] }
 0x2aa   :  { %2611 = vmatprep.mubr.f32.mxu1 %v3215_v0 }
 0x2ad   :  { %2612 = vmatmul.mubr.f32.vlgmr.msra.gmra.mrb[0].mxu1 %v3235_v34 }
 0x2ae   :  { %2794 = vmatpush3.bf16.msra.mxu1 %v2791_v27  ;;  %2614 = vmatprep.mubr.f32.mxu1 %v3240_v36 }
 0x2af   :  { %2796 = vmatprep.subr.bf16.mxu1 %v3294_v15 }
 0x2b1   :  { %2615 = vmatmul.mubr.f32.gmra.mrb[2].mxu1 %v3256_v43 }
 0x2b2   :  { %2617 = vmatprep.mubr.f32.mxu1 %v3258_v44 }
 0x2b5   :  { %2618 = vmatmul.mubr.f32.gmra.mrb[4].mxu1 %v3270_v52 }
 0x2b6   :  { %2620 = vmatprep.mubr.f32.mxu1 %v3275_v57 }
 0x2b9   :  { %2621 = vmatmul.mubr.f32.gmra.mrb[6].mxu1 %v3285_v7 }
 0x2ba   :  { %2627 = vmatprep.mubr.f32.mxu1 %v3218_v53  ;;  %v3000_v53 = vmov 0  }
 0x2bb   :  { %2872 = vset.pattern.permute.xlu1 %v3000_v53 }
 0x2bd   :  { %2628 = vmatmul.mubr.f32.vlgmr.msra.gmra.mrb[0].mxu1 %v3248_v40 }
 0x2be   :  { %2798 = vmatpush3.bf16.msra.mxu1 %v3294_v15  ;;  %2630 = vmatprep.mubr.f32.mxu1 %v3254_v42 }
 0x2bf   :  { %2800 = vmatprep.subr.bf16.mxu1 %v2799_v35 }
 0x2c1   :  { %2631 = vmatmul.mubr.f32.gmra.mrb[2].mxu1 %v3268_v51 }
 0x2c2   :  { %2633 = vmatprep.mubr.f32.mxu1 %v3273_v56 }
 0x2c5   :  { %2634 = vmatmul.mubr.f32.gmra.mrb[4].mxu1 %v3283_v6 }
 0x2c6   :  { %2636 = vmatprep.mubr.f32.mxu1 %v3292_v14 }
 0x2c9   :  { %2637 = vmatmul.mubr.f32.gmra.mrb[6].mxu1 %v989_v24 }
 0x2ca   :  { %2643 = vmatprep.mubr.f32.mxu1 %v920_v11  ;;  %v3001_v11 = vmov 1  }
 0x2cb   :  { %2875 = vset.pattern.permute.xlu0 %v3001_v11 }
 0x2cd   :  { %2644 = vmatmul.mubr.f32.vlgmr.msra.gmra.mrb[0].mxu1 %v930_v48 }
 0x2ce   :  { %2802 = vmatpush3.bf16.msra.mxu1 %v2799_v35  ;;  %2646 = vmatprep.mubr.f32.mxu1 %v940_v50  ;;  %v1968_v35 = vstv %s2347_s12 }
 0x2cf   :  { %2804 = vmatprep.subr.bf16.mxu1 %v3294_v15 }
 0x2d1   :  { %2647 = vmatmul.mubr.f32.gmra.mrb[2].mxu1 %v950_v5 }
 0x2d2   :  { %2649 = vmatprep.mubr.f32.mxu1 %v960_v10 }
 0x2d5   :  { %2650 = vmatmul.mubr.f32.gmra.mrb[4].mxu1 %v970_v23  ;;  %v1950_v23 = vstv %s2340_s26 }
 0x2d6   :  { %2652 = vmatprep.mubr.f32.mxu1 %v980_v4  ;;  %v1951_v24 = vsel %vm1923_vm5, %v1948_v22, %v1950_v23  ;;  %v1943_v4 = vstv %s1942_s30  ;;  %v1794_v22 = vld [vmem:[#allocation2 + $0xc8] sm:$0xff]  ;;  %v1795_v23 = vld [vmem:[#allocation2 + $0xd0] sm:$0xff] }
 0x2d7   :  { %v1946_v12 = vsel %vm1923_vm5, %v1943_v4, %v1945_v63 }
 0x2d9   :  { %2653 = vmatmul.mubr.f32.gmra.mrb[6].mxu1 %v990_v62  ;;  %v1953_v62 = vstv %s2341_s7 }
 0x2da   :  { %2659 = vmatprep.mubr.f32.mxu1 %v3215_v0  ;;  %v1956_v27 = vsel %vm1923_vm5, %v1953_v62, %v1955_v17 }
 0x2dd   :  { %2660 = vmatmul.mubr.f32.vlgmr.msra.gmra.mrb[0].mxu1 %v3235_v34 }
 0x2de   :  { %2806 = vmatpush3.bf16.msra.mxu1 %v3294_v15  ;;  %2662 = vmatprep.mubr.f32.mxu1 %v3240_v36 }
 0x2e1   :  { %2663 = vmatmul.mubr.f32.gmra.mrb[2].mxu1 %v3256_v43 }
 0x2e2   :  { %2665 = vmatprep.mubr.f32.mxu1 %v3258_v44 }
 0x2e5   :  { %2666 = vmatmul.mubr.f32.gmra.mrb[4].mxu1 %v3270_v52 }
 0x2e6   :  { %2668 = vmatprep.mubr.f32.mxu1 %v3275_v57 }
 0x2e9   :  { %2669 = vmatmul.mubr.f32.gmra.mrb[6].mxu1 %v3285_v7 }
 0x2ea   :  { %2675 = vmatprep.mubr.f32.mxu1 %v3215_v0 }
 0x2ed   :  { %2676 = vmatmul.mubr.f32.vlgmr.msra.gmra.mrb[0].mxu1 %v3235_v34 }
 0x2ee   :  { %2678 = vmatprep.mubr.f32.mxu1 %v3240_v36 }
 0x2f1   :  { %2679 = vmatmul.mubr.f32.gmra.mrb[2].mxu1 %v3256_v43 }
 0x2f2   :  { %2681 = vmatprep.mubr.f32.mxu1 %v3258_v44 }
 0x2f5   :  { %2682 = vmatmul.mubr.f32.gmra.mrb[4].mxu1 %v3270_v52 }
 0x2f6   :  { %2684 = vmatprep.mubr.f32.mxu1 %v3275_v57 }
 0x2f9   :  { %2685 = vmatmul.mubr.f32.gmra.mrb[6].mxu1 %v3285_v7 }
 0x3c0   :  { %v2677_v0 = vpop.f32.mrb[0].mxu1 }
 0x3c1   :  { %v2331_v37 = vmul.f32 -1.442695, %v2677_v0  ;;  %v1565_v34 = vpop.f32.mrb[1].mxu1  ;;  %v1978_v0 = vstv %s2351_s14 }
 0x3c2   :  { %v2330_v38 = vmul.f32 -1.442695, %v1565_v34 }
 0x3c3   :  { %2877 = vpow2.f32 %v2331_v37  ;;  %v1980_v37 = vstv %s2352_s15 }
 0x3c4   :  { %2879 = vpow2.f32 %v2330_v38  ;;  %v2680_v36 = vpop.f32.mrb[2].mxu1  ;;  %v1981_v34 = vsel %vm1923_vm5, %v1978_v0, %v1980_v37 }
 0x3c5   :  { %v2333_v39 = vmul.f32 -1.442695, %v2680_v36  ;;  %v1577_v40 = vpop.f32.mrb[3].mxu1 }
 0x3c6   :  { %v2332_v41 = vmul.f32 -1.442695, %v1577_v40  ;;  %v1788_v40 = vld [vmem:[#allocation2 + $0x98] sm:$0xff] }
 0x3c7   :  { %2881 = vpow2.f32 %v2333_v39  ;;  %v1787_v39 = vld [vmem:[#allocation2 + $0x90] sm:$0xff] }
 0x3c8   :  { %2883 = vpow2.f32 %v2332_v41  ;;  %v2683_v42 = vpop.f32.mrb[4].mxu1 }
 0x3c9   :  { %v2335_v43 = vmul.f32 -1.442695, %v2683_v42  ;;  %v1589_v44 = vpop.f32.mrb[5].mxu1 }
 0x3ca   :  { %v2334_v45 = vmul.f32 -1.442695, %v1589_v44  ;;  %v1786_v44 = vld [vmem:[#allocation2 + $0x88] sm:$0xff] }
 0x3cb   :  { %2885 = vpow2.f32 %v2335_v43  ;;  %v1785_v43 = vld [vmem:[#allocation2 + $0x80] sm:$0xff] }
 0x3cc   :  { %v2686_v46 = vpop.f32.mrb[6].mxu1  ;;  %2887 = vpow2.f32 %v2334_v45  ;;  %v1789_v45 = vld [vmem:[#allocation2 + $0xa0] sm:$0xff] }
 0x3cd   :  { %v2878_v47 = vpop.eup %2877  ;;  %v1601_v48 = vpop.f32.mrb[7].mxu1  ;;  %v2337_v57 = vmul.f32 -1.442695, %v2686_v46  ;;  %v1790_v46 = vld [vmem:[#allocation2 + $0xa8] sm:$0xff] }
 0x3ce   :  { %v2880_v49 = vpop.eup %2879  ;;  %v1636_v50 = vadd.f32 1.0, %v2878_v47  ;;  %v2336_v52 = vmul.f32 -1.442695, %v1601_v48 }
 0x3cf   :  { %v1635_v51 = vadd.f32 1.0, %v2880_v49 }
 0x3d0   :  { %2889 = vrcp.f32 %v1636_v50 }
 0x3d1   :  { %v2882_v54 = vpop.eup %2881  ;;  %2891 = vrcp.f32 %v1635_v51 }
 0x3d2   :  { %v2884_v55 = vpop.eup %2883  ;;  %v1638_v56 = vadd.f32 1.0, %v2882_v54  ;;  %2893 = vpow2.f32 %v2336_v52  ;;  %v1791_v52 = vld [vmem:[#allocation2 + $0xb0] sm:$0xff]  ;;  %v1792_v54 = vld [vmem:[#allocation2 + $0xb8] sm:$0xff] }
 0x3d3   :  { %v1637_v58 = vadd.f32 1.0, %v2884_v55 }
 0x3d4   :  { %2895 = vrcp.f32 %v1638_v56 }
 0x3d5   :  { %v2886_v59 = vpop.eup %2885  ;;  %2897 = vpow2.f32 %v2337_v57 }
 0x3d6   :  { %v2888_v60 = vpop.eup %2887  ;;  %2899 = vrcp.f32 %v1637_v58  ;;  %v1640_v61 = vadd.f32 1.0, %v2886_v59 }
 0x3d7   :  { %v1639_v7 = vadd.f32 1.0, %v2888_v60 }
 0x3d8   :  { %2901 = vrcp.f32 %v1640_v61 }
 0x3d9   :  { %2903 = vrcp.f32 %v1639_v7 }
 0x3da   :  { %v2890_v1 = vpop.eup %2889 }
 0x3db   :  { %v2892_v5 = vpop.eup %2891  ;;  %1666 = vperm.xlu1 %2872, %v2890_v1  }
 0x3dc   :  { %1802 = vperm.xlu0 %2875, %v2892_v5   ;;  %v2894_v6 = vpop.eup %2893 }
 0x3dd   :  { %v1641_v9 = vadd.f32 1.0, %v2894_v6  ;;  %v2918_v6 = vld [vmem:[#allocation2 + $0x8] sm:$0xff] }
 0x3de   :  { %v2896_v8 = vpop.eup %2895 }
 0x3df   :  { %2873 = vset.pattern.permute.xlu1 %v3001_v11  ;;  %v2898_v10 = vpop.eup %2897  ;;  %2905 = vrcp.f32 %v1641_v9 }
 0x3e0   :  { %1806 = vperm.xlu1 %2873, %v2890_v1   ;;  %1814 = vperm.xlu0 %2875, %v2896_v8   ;;  %v2900_v14 = vpop.eup %2899  ;;  %v1642_v15 = vadd.f32 1.0, %v2898_v10  ;;  %v2917_v1 = vld [vmem:[#allocation2] sm:$0xff] }
 0x3e2   :  { %v2902_v16 = vpop.eup %2901  ;;  %2907 = vrcp.f32 %v1642_v15  ;;  %v2919_v15 = vld [vmem:[#allocation2 + $0x10] sm:$0xff] }
 0x3e3   :  { %v2904_v19 = vpop.eup %2903 }
 0x3e4   :  { %2874 = vset.pattern.permute.xlu1 %v3000_v53  ;;  %1810 = vperm.xlu0 %2875, %v2900_v14  }
 0x3e5   :  { %1661 = vperm.xlu1 %2874, %v2892_v5  }
 0x3e8   :  { %1822 = vperm.xlu0 %2875, %v2902_v16  }
 0x3e9   :  { %1676 = vperm.xlu1 %2874, %v2896_v8   ;;  %v2906_v20 = vpop.eup %2905 }
 0x3ec   :  { %1818 = vperm.xlu0 %2875, %v2904_v19   ;;  %v2908_v21 = vpop.eup %2907 }
 0x3ed   :  { %1671 = vperm.xlu1 %2874, %v2900_v14  }
 0x3f0   :  { %1826 = vperm.xlu0 %2875, %v2906_v20  }
 0x3f1   :  { %1686 = vperm.xlu1 %2874, %v2902_v16  }
 0x3f4   :  { %1830 = vperm.xlu0 %2875, %v2908_v21  }
 0x3f5   :  { %1681 = vperm.xlu1 %2874, %v2904_v19   ;;  %v2920_v19 = vld [vmem:[#allocation2 + $0x18] sm:$0xff] }
 0x3f8   :  { %2876 = vset.pattern.permute.xlu0 %v3000_v53  ;;  %v1970_v53 = vstv %s2348_s13 }
 0x3f9   :  { %1691 = vperm.xlu1 %2874, %v2906_v20   ;;  %2020 = vperm.xlu0 %2876, %v1951_v24   ;;  %v1971_v11 = vsel %vm1923_vm5, %v1968_v35, %v1970_v53  ;;  %v1796_v24 = vld [vmem:[#allocation2 + $0xd8] sm:$0xff]  ;;  %v2923_v35 = vld [vmem:[#allocation2 + $0x30] sm:$0xff] }
 0x3fd   :  { %1696 = vperm.xlu1 %2874, %v2908_v21   ;;  %2081 = vperm.xlu0 %2876, %v1966_v3   ;;  %v1793_v21 = vld [vmem:[#allocation2 + $0xc0] sm:$0xff] }
 0x401   :  { %1996 = vperm.xlu1 %2874, %v1946_v12   ;;  %2119 = vperm.xlu0 %2876, %v1976_v13  }
 0x405   :  { %2042 = vperm.xlu1 %2874, %v1956_v27   ;;  %2165 = vperm.xlu0 %2876, %v1986_v29   ;;  %v2922_v29 = vld [vmem:[#allocation2 + $0x28] sm:$0xff] }
 0x409   :  { %2066 = vperm.xlu1 %2874, %v1961_v33   ;;  %v1798_v33 = vld [vmem:[#allocation2 + $0xe8] sm:$0xff] }
 0x40d   :  { %2097 = vperm.xlu1 %2874, %v1971_v11   ;;  %v2924_v11 = vld [vmem:[#allocation2 + $0x38] sm:$0xff] }
 0x411   :  { %2143 = vperm.xlu1 %2874, %v1981_v34  }
 0x45a   :  { %v1667_v38 = vpop.permute.xlu1 %1666 }
 0x45b   :  { %v1803_v36 = vpop.permute.xlu0 %1802  ;;  %v3392_v16 = vmul.f32 %v2919_v15, %v1667_v38  ;;  %v3394_v20 = vmul.f32 %v2920_v19, %v1667_v38 }
 0x45c   :  { %v3370_v50 = vmul.f32 %v1803_v36, %v1785_v43  ;;  %v3372_v51 = vmul.f32 %v1803_v36, %v1786_v44 }
 0x45f   :  { %v1807_v41 = vpop.permute.xlu1 %1806  ;;  %v1815_v42 = vpop.permute.xlu0 %1814 }
 0x460   :  { %v3366_v47 = vmul.f32 %v1807_v41, %v1787_v39  ;;  %v3368_v48 = vmul.f32 %v1807_v41, %v1788_v40  ;;  %v3382_v60 = vmul.f32 %v1815_v42, %v1791_v52  ;;  %v3384_v61 = vmul.f32 %v1815_v42, %v1792_v54  ;;  %v1799_v54 = vld [vmem:[#allocation2 + $0xf0] sm:$0xff] }
 0x462   :  { %v1866_v58 = vadd.f32 %v3366_v47, %v3370_v50  ;;  %v1879_v59 = vadd.f32 %v3368_v48, %v3372_v51  ;;  %v1895_v26 = vmax.f32 %v3366_v47, %v3382_v60  ;;  %v1908_v28 = vmax.f32 %v3368_v48, %v3384_v61 }
 0x463   :  { %v1811_v49 = vpop.permute.xlu0 %1810 }
 0x464   :  { %v3374_v55 = vmul.f32 %v1811_v49, %v1789_v45  ;;  %v3376_v56 = vmul.f32 %v1811_v49, %v1790_v46  ;;  %v1662_v57 = vpop.permute.xlu1 %1661 }
 0x465   :  { %v3386_v5 = vmul.f32 %v2917_v1, %v1662_v57  ;;  %v3388_v7 = vmul.f32 %v2918_v6, %v1662_v57  ;;  %v1800_v57 = vld [vmem:[#allocation2 + $0xf8] sm:$0xff] }
 0x466   :  { %v1867_v9 = vadd.f32 %v1866_v58, %v3374_v55  ;;  %v1880_v10 = vadd.f32 %v1879_v59, %v3376_v56  ;;  %v1894_v38 = vmax.f32 %v3370_v50, %v3374_v55  ;;  %v1907_v36 = vmax.f32 %v3372_v51, %v3376_v56 }
 0x467   :  { %v1823_v8 = vpop.permute.xlu0 %1822  ;;  %v1731_v3 = vadd.f32 %v3392_v16, %v3386_v5  ;;  %v1744_v4 = vadd.f32 %v3394_v20, %v3388_v7 }
 0x468   :  { %v1677_v14 = vpop.permute.xlu1 %1676  ;;  %v1868_v32 = vadd.f32 %v1867_v9, %v3382_v60  ;;  %v1881_v2 = vadd.f32 %v1880_v10, %v3384_v61  ;;  %v3410_v17 = vmul.f32 %v1823_v8, %v1795_v23  ;;  %v3412_v18 = vmul.f32 %v1823_v8, %v1796_v24 }
 0x469   :  { %v3418_v53 = vmul.f32 %v2923_v35, %v1677_v14  ;;  %v3420_v0 = vmul.f32 %v2924_v11, %v1677_v14  ;;  %v2928_v35 = vld [vmem:[#allocation2 + $0x58] sm:$0xff] }
 0x46a   :  { %v1897_v49 = vmax.f32 %v1895_v26, %v3410_v17  ;;  %v1910_v52 = vmax.f32 %v1908_v28, %v3412_v18 }
 0x46b   :  { %v1819_v63 = vpop.permute.xlu0 %1818  ;;  %v1760_v58 = vmax.f32 %v3392_v16, %v3418_v53  ;;  %v1773_v59 = vmax.f32 %v3394_v20, %v3420_v0 }
 0x46c   :  { %v3406_v12 = vmul.f32 %v1819_v63, %v1793_v21  ;;  %v3408_v13 = vmul.f32 %v1819_v63, %v1794_v22  ;;  %v1672_v62 = vpop.permute.xlu1 %1671  ;;  %v2926_v63 = vld [vmem:[#allocation2 + $0x48] sm:$0xff] }
 0x46d   :  { %v3414_v27 = vmul.f32 %v2921_v25, %v1672_v62  ;;  %v3416_v30 = vmul.f32 %v2922_v29, %v1672_v62 }
 0x46e   :  { %v1869_v37 = vadd.f32 %v1868_v32, %v3406_v12  ;;  %v1882_v34 = vadd.f32 %v1881_v2, %v3408_v13  ;;  %v1896_v1 = vmax.f32 %v1894_v38, %v3406_v12  ;;  %v1909_v6 = vmax.f32 %v1907_v36, %v3408_v13 }
 0x46f   :  { %v1732_v39 = vadd.f32 %v1731_v3, %v3414_v27  ;;  %v1745_v40 = vadd.f32 %v1744_v4, %v3416_v30  ;;  %v1827_v41 = vpop.permute.xlu0 %1826  ;;  %v1759_v8 = vmax.f32 %v3386_v5, %v3414_v27  ;;  %v1772_v9 = vmax.f32 %v3388_v7, %v3416_v30  ;;  %v2925_v3 = vld [vmem:[#allocation2 + $0x40] sm:$0xff] }
 0x470   :  { %v1870_v42 = vadd.f32 %v1869_v37, %v3410_v17  ;;  %v1883_v43 = vadd.f32 %v1882_v34, %v3412_v18  ;;  %v3432_v44 = vmul.f32 %v1827_v41, %v1797_v31  ;;  %v3434_v45 = vmul.f32 %v1827_v41, %v1798_v33  ;;  %v1687_v46 = vpop.permute.xlu1 %1686  ;;  %v2927_v31 = vld [vmem:[#allocation2 + $0x50] sm:$0xff] }
 0x471   :  { %v1733_v14 = vadd.f32 %v1732_v39, %v3418_v53  ;;  %v1746_v15 = vadd.f32 %v1745_v40, %v3420_v0  ;;  %v3466_v33 = vmul.f32 %v2927_v31, %v1687_v46  ;;  %v3468_v11 = vmul.f32 %v2928_v35, %v1687_v46 }
 0x472   :  { %3685 = vst [vmem:[#allocation11_spill] sm:$0xff] %v3432_v44  ;;  %3686 = vst [vmem:[#allocation12_spill] sm:$0xff] %v3434_v45  ;;  %v1871_v19 = vadd.f32 %v1870_v42, %v3432_v44  ;;  %v1884_v21 = vadd.f32 %v1883_v43, %v3434_v45  ;;  %v1898_v26 = vmax.f32 %v1896_v1, %v3432_v44 }
 0x473   :  { %v1831_v10 = vpop.permute.xlu0 %1830  ;;  %v1911_v28 = vmax.f32 %v1909_v6, %v3434_v45 }
 0x474   :  { %v3452_v22 = vmul.f32 %v1831_v10, %v1799_v54  ;;  %v3454_v23 = vmul.f32 %v1831_v10, %v1800_v57  ;;  %v1682_v24 = vpop.permute.xlu1 %1681  ;;  %v2930_v54 = vld [vmem:[#allocation2 + $0x68] sm:$0xff] }
 0x475   :  { %v3458_v4 = vmul.f32 %v2925_v3, %v1682_v24  ;;  %v3460_v32 = vmul.f32 %v2926_v63, %v1682_v24 }
 0x476   :  { %3687 = vst [vmem:[#allocation13_spill] sm:$0xff] %v3452_v22  ;;  %3688 = vst [vmem:[#allocation14_spill] sm:$0xff] %v3454_v23  ;;  %v1872_v2 = vadd.f32 %v1871_v19, %v3452_v22  ;;  %v1885_v62 = vadd.f32 %v1884_v21, %v3454_v23  ;;  %v1899_v25 = vmax.f32 %v1897_v49, %v3452_v22  ;;  %v2929_v49 = vld [vmem:[#allocation2 + $0x60] sm:$0xff] }
 0x477   :  { %v1912_v29 = vmax.f32 %v1910_v52, %v3454_v23  ;;  %v1734_v37 = vadd.f32 %v1733_v14, %v3458_v4  ;;  %v1747_v34 = vadd.f32 %v1746_v15, %v3460_v32  ;;  %v1762_v14 = vmax.f32 %v1760_v58, %v3466_v33 }
 0x478   :  { %v1873_v38 = vrot.slane %v1872_v2, 4  ;;  %v1886_v36 = vrot.slane %v1885_v62, 4  ;;  %v1900_v39 = vmax.f32 %v1898_v26, %v1899_v25  ;;  %v1692_v41 = vpop.permute.xlu1 %1691  ;;  %v1775_v15 = vmax.f32 %v1773_v59, %v3468_v11  ;;  %v2931_v25 = vld [vmem:[#allocation2 + $0x70] sm:$0xff] }
 0x479   :  { %v1913_v40 = vmax.f32 %v1911_v28, %v1912_v29  ;;  %v1735_v42 = vadd.f32 %v1734_v37, %v3466_v33  ;;  %v1748_v43 = vadd.f32 %v1747_v34, %v3468_v11  ;;  %v3474_v52 = vmul.f32 %v2929_v49, %v1692_v41 }
 0x47a   :  { %v3476_v57 = vmul.f32 %v2930_v54, %v1692_v41  ;;  %v1874_v46 = vadd.f32 %v1873_v38, %v1872_v2  ;;  %v1887_v1 = vadd.f32 %v1886_v36, %v1885_v62  ;;  %v1901_v6 = vrot.slane %v1900_v39, 4  ;;  %v2932_v62 = vld [vmem:[#allocation2 + $0x78] sm:$0xff] }
 0x47b   :  { %v1914_v10 = vrot.slane %v1913_v40, 4  ;;  %v1761_v24 = vmax.f32 %v1759_v8, %v3458_v4  ;;  %v1774_v26 = vmax.f32 %v1772_v9, %v3460_v32  ;;  %v1736_v3 = vadd.f32 %v1735_v42, %v3474_v52 }
 0x47c   :  { %v1875_v19 = vrot.slane %v1874_v46, 2  ;;  %v1888_v21 = vrot.slane %v1887_v1, 2  ;;  %v1697_v28 = vpop.permute.xlu1 %1696  ;;  %v1749_v63 = vadd.f32 %v1748_v43, %v3476_v57  ;;  %v1902_v58 = vmax.f32 %v1900_v39, %v1901_v6 }
 0x47d   :  { %v3484_v2 = vmul.f32 %v2931_v25, %v1697_v28  ;;  %v3486_v29 = vmul.f32 %v2932_v62, %v1697_v28  ;;  %v1915_v31 = vmax.f32 %v1913_v40, %v1914_v10  ;;  %v1763_v59 = vmax.f32 %v1761_v24, %v3474_v52 }
 0x47e   :  { %v1776_v35 = vmax.f32 %v1774_v26, %v3476_v57  ;;  %v1876_v38 = vadd.f32 %v1875_v19, %v1874_v46  ;;  %v1889_v36 = vadd.f32 %v1888_v21, %v1887_v1  ;;  %v1903_v39 = vrot.slane %v1902_v58, 2 }
 0x47f   :  { %v1737_v8 = vadd.f32 %v1736_v3, %v3484_v2  ;;  %v1750_v9 = vadd.f32 %v1749_v63, %v3486_v29  ;;  %v1764_v37 = vmax.f32 %v1762_v14, %v3484_v2  ;;  %v1777_v34 = vmax.f32 %v1775_v15, %v3486_v29 }
 0x480   :  { %v1916_v40 = vrot.slane %v1915_v31, 2  ;;  %v1877_v26 = vrot.slane %v1876_v38, 1  ;;  %v1890_v28 = vrot.slane %v1889_v36, 1  ;;  %v1904_v62 = vmax.f32 %v1902_v58, %v1903_v39 }
 0x481   :  { %v1738_v41 = vrot.slane %v1737_v8, 4  ;;  %v1751_v42 = vrot.slane %v1750_v9, 4  ;;  %v1765_v43 = vmax.f32 %v1763_v59, %v1764_v37  ;;  %v1778_v49 = vmax.f32 %v1776_v35, %v1777_v34 }
 0x482   :  { %v1917_v15 = vmax.f32 %v1915_v31, %v1916_v40  ;;  %v1878_v59 = vadd.f32 %v1877_v26, %v1876_v38  ;;  %v1891_v35 = vadd.f32 %v1890_v28, %v1889_v36 }
 0x483   :  { %v1739_v54 = vadd.f32 %v1738_v41, %v1737_v8  ;;  %v1752_v6 = vadd.f32 %v1751_v42, %v1750_v9  ;;  %v1766_v10 = vrot.slane %v1765_v43, 4  ;;  %v1779_v24 = vrot.slane %v1778_v49, 4 }
 0x484   :  { %v1905_v41 = vrot.slane %v1904_v62, 1  ;;  %v1918_v42 = vrot.slane %v1917_v15, 1 }
 0x485   :  { %v1740_v3 = vrot.slane %v1739_v54, 2  ;;  %v1753_v63 = vrot.slane %v1752_v6, 2  ;;  %v1767_v25 = vmax.f32 %v1765_v43, %v1766_v10  ;;  %v1780_v14 = vmax.f32 %v1778_v49, %v1779_v24 }
 0x486   :  { %v1892_v43 = vmul.f32 0.015625, %v1878_v59  ;;  %v1893_v49 = vmul.f32 0.015625, %v1891_v35  ;;  %v1906_v38 = vmax.f32 %v1904_v62, %v1905_v41  ;;  %v1919_v36 = vmax.f32 %v1917_v15, %v1918_v42 }
 0x487   :  { %v1741_v46 = vadd.f32 %v1740_v3, %v1739_v54  ;;  %v1754_v1 = vadd.f32 %v1753_v63, %v1752_v6  ;;  %v1768_v19 = vrot.slane %v1767_v25, 2  ;;  %v1781_v21 = vrot.slane %v1780_v14, 2 }
 0x489   :  { %v1742_v37 = vrot.slane %v1741_v46, 1  ;;  %v1755_v34 = vrot.slane %v1754_v1, 1  ;;  %v1769_v8 = vmax.f32 %v1767_v25, %v1768_v19  ;;  %v1782_v9 = vmax.f32 %v1780_v14, %v1781_v21 }
 0x48a   :  { %v1929_v14 = vlaneseq }
 0x48b   :  { %v1743_v23 = vadd.f32 %v1742_v37, %v1741_v46  ;;  %v1756_v22 = vadd.f32 %v1755_v34, %v1754_v1  ;;  %v1770_v45 = vrot.slane %v1769_v8, 1  ;;  %v1783_v44 = vrot.slane %v1782_v9, 1 }
 0x48c   :  { %v3529_v46 = vand.u32 127, %v1929_v14  ;;  %v2217_v42 = vshrl.u32 %v1929_v14, 7 }
 0x48d   :  { %v1757_v58 = vmul.f32 0.015625, %v1743_v23  ;;  %v1758_v31 = vmul.f32 0.015625, %v1756_v22  ;;  %v1771_v39 = vmax.f32 %v1769_v8, %v1770_v45  ;;  %v1784_v40 = vmax.f32 %v1782_v9, %v1783_v44  ;;  %v1997_v44 = vpop.permute.xlu1 %1996  ;;  %v2021_v22 = vpop.permute.xlu0 %2020 }
 0x48e   :  { %v1932_v21 = vand.u32 15, %v3529_v46  ;;  %vm1991_vm8 = vcmp.lt.s32.totalorder %v3529_v46, 17  ;;  %vm2015_vm9 = vcmp.lt.s32.totalorder %v3529_v46, 16  ;;  %v3535_v59 = vadd.s32 128, %v3529_v46 }
 0x48f   :  { %v1921_v54 = vsel %vm1920_vm6, %v1757_v58, %v1892_v43  ;;  %v1922_v6 = vsel %vm1920_vm6, %v1758_v31, %v1893_v49  ;;  %vm1934_vm10 = vcmp.ge.s32.totalorder %v3529_v46, 16  ;;  %vm2037_vm13 = vcmp.lt.s32.totalorder %v3529_v46, 15 }
 0x490   :  { %v1924_v10 = vsel %vm1923_vm5, %v1921_v54, %v1771_v39  ;;  %v1925_v24 = vsel %vm1923_vm5, %v1922_v6, %v1784_v40  ;;  %vm3538_vm11 = vcmp.ge.s32.totalorder %v1932_v21, 1  ;;  %vm3542_vm12 = vcmp.le.s32.totalorder %v1932_v21, 14 }
 0x491   :  { %v3496_v26 = vsel %vm1926_vm7, %v1924_v10, %v1906_v38  ;;  %v3498_v28 = vsel %vm1926_vm7, %v1925_v24, %v1919_v36  ;;  %v2043_v45 = vpop.permute.xlu1 %2042  ;;  %v3518_v3 = vpop.permute.xlu0 %2081  ;;  %v1933_v43 = vand.u32 15, %v3535_v59  ;;  %vm3552_vm14 = vmand %vm1934_vm10, %vm3538_vm11  ;;  %vm2061_vm0 = vcmp.lt.s32.totalorder %v3529_v46, 1 }
 0x492   :  { %1989 = vrot.lane.b32.xlu1 %v3498_v28, %s3002_s16  ;;  %1987 = vrot.lane.b32.xlu0 %v3496_v26, %s3002_s16  ;;  %vm3560_vm15 = vmand %vm1934_vm10, %vm3542_vm12  ;;  %vm2092_vm3 = vcmp.lt.s32.totalorder %v3529_v46, 127  ;;  %vm2114_vm4 = vcmp.lt.s32.totalorder %v3529_v46, 113  ;;  %vm1937_vm5 = vcmp.lt.s32.totalorder %v3535_v59, 240  ;;  %vm2138_vm6 = vcmp.lt.s32.totalorder %v3529_v46, 112 }
 0x493   :  { %vm3567_vm1 = vcmp.ge.s32.totalorder %v1933_v43, 1  ;;  %vm3571_vm2 = vcmp.le.s32.totalorder %v1933_v43, 14 }
 0x494   :  { %vm3605_vm7 = vmand %vm1937_vm5, %vm3567_vm1 }
 0x495   :  { %v2067_v23 = vpop.permute.xlu1 %2066  ;;  %v3522_v25 = vpop.permute.xlu0 %2119 }
 0x496   :  { %2013 = vrot.lane.b32.xlu1 %v3498_v28, %s2997_s28  ;;  %2011 = vrot.lane.b32.xlu0 %v3496_v26, %s2997_s28 }
 0x499   :  { %v3520_v63 = vpop.permute.xlu1 %2097  ;;  %v3526_v15 = vpop.permute.xlu0 %2165 }
 0x49a   :  { %2033 = vrot.lane.b32.xlu1 %v3496_v26, %s3003_s17  ;;  %2035 = vrot.lane.b32.xlu0 %v3498_v28, %s3003_s17 }
 0x49d   :  { %v3524_v62 = vpop.permute.xlu1 %2143 }
 0x49e   :  { %2059 = vrot.lane.b32.xlu1 %v3498_v28, %s3004_s18  ;;  %2057 = vrot.lane.b32.xlu0 %v3496_v26, %s3004_s18 }
 0x4a2   :  { %2090 = vrot.lane.b32.xlu1 %v3498_v28, %s3005_s19  ;;  %2088 = vrot.lane.b32.xlu0 %v3496_v26, %s3005_s19 }
 0x4a6   :  { %2110 = vrot.lane.b32.xlu1 %v3496_v26, %s3006_s20  ;;  %2112 = vrot.lane.b32.xlu0 %v3498_v28, %s3006_s20 }
 0x4aa   :  { %2134 = vrot.lane.b32.xlu1 %v3496_v26, %s3007_s21  ;;  %2136 = vrot.lane.b32.xlu0 %v3498_v28, %s3007_s21 }
 0x4ae   :  { %2156 = vrot.lane.b32.xlu1 %v3496_v26, %s3008_s22  ;;  %2158 = vrot.lane.b32.xlu0 %v3498_v28, %s3008_s22 }
 0x504   :  { %v1988_v1 = vpop.permute.xlu0 %1987  ;;  %v1990_v19 = vpop.permute.xlu1 %1989 }
 0x505   :  { %v1993_v8 = vsel %vm1991_vm8, %v1990_v19, %v1988_v1  ;;  %v1992_v49 = vsel %vm1991_vm8, %v1988_v1, %v1990_v19  ;;  %vm2160_vm8 = vcmp.lt.s32.totalorder %v3529_v46, 111 }
 0x506   :  { %v1999_v31 = vmul.f32 %v1997_v44, %v1993_v8  ;;  %v2000_v10 = vmul.f32 %v1997_v44, %v1992_v49 }
 0x508   :  { %v2012_v35 = vpop.permute.xlu0 %2011  ;;  %v2014_v37 = vpop.permute.xlu1 %2013  ;;  %v2007_v8 = vsel %vm3552_vm14, %v1999_v31, 0.0 }
 0x509   :  { %v2017_v9 = vsel %vm2015_vm9, %v2014_v37, %v2012_v35  ;;  %v2016_v39 = vsel %vm2015_vm9, %v2012_v35, %v2014_v37  ;;  %vm2171_vm9 = vmand %vm1937_vm5, %vm3571_vm2 }
 0x50a   :  { %v2023_v41 = vmul.f32 %v2021_v22, %v2017_v9  ;;  %v2024_v35 = vmul.f32 %v2021_v22, %v2016_v39  ;;  %v2008_v22 = vsel %vm3567_vm1, %v2000_v10, 0.0 }
 0x50c   :  { %v2036_v40 = vpop.permute.xlu0 %2035  ;;  %v2034_v38 = vpop.permute.xlu1 %2033  ;;  %v2029_v24 = vsel %vm1934_vm10, %v2023_v41, 0.0  ;;  %v2032_v58 = vadd.f32 %v2024_v35, %v2008_v22 }
 0x50d   :  { %v2038_v54 = vsel %vm2037_vm13, %v2034_v38, %v2036_v40  ;;  %v2039_v6 = vsel %vm2037_vm13, %v2036_v40, %v2034_v38  ;;  %v2031_v41 = vadd.f32 %v2029_v24, %v2007_v8 }
 0x50e   :  { %v2045_v1 = vmul.f32 %v2043_v45, %v2039_v6  ;;  %v2046_v19 = vmul.f32 %v2043_v45, %v2038_v54 }
 0x510   :  { %v2053_v44 = vsel %vm3560_vm15, %v2045_v1, 0.0  ;;  %v2058_v9 = vpop.permute.xlu0 %2057  ;;  %v2060_v49 = vpop.permute.xlu1 %2059  ;;  %v2054_v43 = vsel %vm3571_vm2, %v2046_v19, 0.0 }
 0x511   :  { %v2062_v40 = vsel %vm2061_vm0, %v2058_v9, %v2060_v49  ;;  %v2063_v45 = vsel %vm2061_vm0, %v2060_v49, %v2058_v9  ;;  %v2055_v31 = vadd.f32 %v2053_v44, %v2031_v41  ;;  %v2056_v1 = vadd.f32 %v2054_v43, %v2032_v58 }
 0x512   :  { %v2069_v39 = vmul.f32 %v2067_v23, %v2063_v45  ;;  %v2070_v38 = vmul.f32 %v2067_v23, %v2062_v40  ;;  %v2084_v23 = vmul.f32 %v3518_v3, %v3496_v26  ;;  %v2085_v40 = vmul.f32 %v3518_v3, %v3498_v28 }
 0x514   :  { %v2075_v36 = vsel %vm3538_vm11, %v2069_v39, 0.0  ;;  %v2076_v54 = vsel %vm3567_vm1, %v2070_v38, 0.0  ;;  %v2089_v6 = vpop.permute.xlu0 %2088  ;;  %v2091_v24 = vpop.permute.xlu1 %2090 }
 0x515   :  { %v2077_v8 = vadd.f32 %v2075_v36, %v2055_v31  ;;  %v2093_v9 = vsel %vm2092_vm3, %v2089_v6, %v2091_v24  ;;  %v2094_v49 = vsel %vm2092_vm3, %v2091_v24, %v2089_v6  ;;  %v2078_v19 = vadd.f32 %v2076_v54, %v2056_v1 }
 0x516   :  { %v2100_v10 = vmul.f32 %v3520_v63, %v2093_v9  ;;  %v2101_v35 = vmul.f32 %v3520_v63, %v2094_v49 }
 0x517   :  { %v2086_v45 = vadd.f32 %v2084_v23, %v2077_v8  ;;  %v2087_v63 = vadd.f32 %v2085_v40, %v2078_v19 }
 0x518   :  { %v2113_v44 = vpop.permute.xlu0 %2112  ;;  %v2111_v41 = vpop.permute.xlu1 %2110  ;;  %v2106_v39 = vsel %vm3542_vm12, %v2100_v10, 0.0  ;;  %v2107_v28 = vsel %vm3571_vm2, %v2101_v35, 0.0 }
 0x519   :  { %v2115_v22 = vsel %vm2114_vm4, %v2111_v41, %v2113_v44  ;;  %v2116_v43 = vsel %vm2114_vm4, %v2113_v44, %v2111_v41  ;;  %v2109_v1 = vadd.f32 %v2107_v28, %v2087_v63 }
 0x51a   :  { %v2122_v38 = vmul.f32 %v3522_v25, %v2115_v22  ;;  %v2123_v26 = vmul.f32 %v3522_v25, %v2116_v43  ;;  %v2108_v25 = vadd.f32 %v2106_v39, %v2086_v45 }
 0x51c   :  { %v2130_v3 = vsel %vm3538_vm11, %v2122_v38, 0.0  ;;  %v2137_v31 = vpop.permute.xlu0 %2136  ;;  %v2135_v36 = vpop.permute.xlu1 %2134  ;;  %v2131_v21 = vsel %vm3605_vm7, %v2123_v26, 0.0 }
 0x51d   :  { %v2139_v54 = vsel %vm2138_vm6, %v2135_v36, %v2137_v31  ;;  %v2140_v6 = vsel %vm2138_vm6, %v2137_v31, %v2135_v36  ;;  %v2132_v8 = vadd.f32 %v2130_v3, %v2108_v25  ;;  %v2133_v23 = vadd.f32 %v2131_v21, %v2109_v1 }
 0x51e   :  { %v2147_v24 = vmul.f32 %v3524_v62, %v2140_v6  ;;  %v2146_v9 = vmul.f32 %v3524_v62, %v2139_v54  ;;  %v2218_v31 = vsub.s32 0, %v2217_v42  ;;  %v2274_v36 = vsub.s32 1, %v2217_v42 }
 0x520   :  { %v2153_v34 = vsel %vm1937_vm5, %v2147_v24, 0.0  ;;  %v2159_v49 = vpop.permute.xlu0 %2158  ;;  %v2157_v10 = vpop.permute.xlu1 %2156  ;;  %v2154_v41 = vadd.f32 %v2146_v9, %v2132_v8 }
 0x521   :  { %v2161_v19 = vsel %vm2160_vm8, %v2157_v10, %v2159_v49  ;;  %v2162_v35 = vsel %vm2160_vm8, %v2159_v49, %v2157_v10  ;;  %v2155_v40 = vadd.f32 %v2153_v34, %v2133_v23 }
 0x522   :  { %v2168_v44 = vmul.f32 %v3526_v15, %v2161_v19  ;;  %v2169_v46 = vmul.f32 %v3526_v15, %v2162_v35 }
 0x524   :  { %v2176_v62 = vsel %vm3542_vm12, %v2168_v44, 0.0  ;;  %v2177_v45 = vsel %vm2171_vm9, %v2169_v46, 0.0  ;;  %v3705_v46 = vld [vmem:[#allocation13_spill] sm:$0xff] }
 0x525   :  { %v2178_v22 = vadd.f32 %v2176_v62, %v2154_v41  ;;  %v2179_v43 = vadd.f32 %v2177_v45, %v2155_v40  ;;  %v3706_v41 = vld [vmem:[#allocation14_spill] sm:$0xff] }
 0x527   :  { %v2182_v39 = vrot.slane %v2178_v22, 2  ;;  %v2183_v38 = vrot.slane %v2179_v43, 2 }
 0x529   :  { %v2186_v37 = vadd.f32 %v2182_v39, %v2178_v22  ;;  %v2187_v26 = vadd.f32 %v2183_v38, %v2179_v43 }
 0x52b   :  { %v2355_v59 = vmul.f32 -1.442695, %v2186_v37  ;;  %v2356_v63 = vmul.f32 -1.442695, %v2187_v26 }
 0x52d   :  { %2909 = vpow2.f32 %v2355_v59 }
 0x52e   :  { %2911 = vpow2.f32 %v2356_v63 }
 0x537   :  { %v2910_v58 = vpop.eup %2909 }
 0x538   :  { %v2912_v28 = vpop.eup %2911  ;;  %v2194_v3 = vadd.f32 1.0, %v2910_v58 }
 0x539   :  { %v2195_v15 = vadd.f32 1.0, %v2912_v28 }
 0x53a   :  { %2913 = vrcp.f32 %v2194_v3 }
 0x53b   :  { %2915 = vrcp.f32 %v2195_v15 }
 0x544   :  { %v2914_v25 = vpop.eup %2913 }
 0x545   :  { %v2916_v54 = vpop.eup %2915  ;;  %v2219_v6 = vrot.slane %v2914_v25, %v2218_v31  ;;  %v2275_v24 = vrot.slane %v2914_v25, %v2274_v36 }
 0x546   :  { %v2223_v21 = vrot.slane %v2916_v54, %v2218_v31  ;;  %v2279_v1 = vrot.slane %v2916_v54, %v2274_v36 }
 0x547   :  { %v2224_v8 = vmul.f32 %v2219_v6, %v3386_v5  ;;  %v2226_v9 = vmul.f32 %v2219_v6, %v3392_v16  ;;  %v2228_v34 = vmul.f32 %v2219_v6, %v3414_v27  ;;  %v2230_v49 = vmul.f32 %v2219_v6, %v3418_v53 }
 0x548   :  { %v2225_v10 = vmul.f32 %v2223_v21, %v3388_v7  ;;  %v2227_v14 = vmul.f32 %v2223_v21, %v3394_v20  ;;  %v2229_v23 = vmul.f32 %v2223_v21, %v3416_v30  ;;  %v2231_v19 = vmul.f32 %v2223_v21, %v3420_v0 }
 0x549   :  { %v2232_v35 = vmul.f32 %v2219_v6, %v3458_v4  ;;  %v2233_v44 = vmul.f32 %v2223_v21, %v3460_v32  ;;  %v2234_v5 = vmul.f32 %v2219_v6, %v3466_v33  ;;  %v2235_v16 = vmul.f32 %v2223_v21, %v3468_v11  ;;  %2240 = vst [vmem:[#allocation7] sm:$0xff] %v2224_v8 }
 0x54a   :  { %2242 = vst [vmem:[#allocation7 + $0x10] sm:$0xff] %v2226_v9  ;;  %2244 = vst [vmem:[#allocation7 + $0x20] sm:$0xff] %v2228_v34  ;;  %v2236_v7 = vmul.f32 %v2219_v6, %v3474_v52  ;;  %v2237_v20 = vmul.f32 %v2223_v21, %v3476_v57  ;;  %v2238_v27 = vmul.f32 %v2219_v6, %v3484_v2  ;;  %v3703_v2 = vld [vmem:[#allocation11_spill] sm:$0xff] }
 0x54b   :  { %2246 = vst [vmem:[#allocation7 + $0x30] sm:$0xff] %v2230_v49  ;;  %v2239_v30 = vmul.f32 %v2223_v21, %v3486_v29  ;;  %2241 = vst [vmem:[#allocation7 + $0x8] sm:$0xff] %v2225_v10  ;;  %v2280_v53 = vmul.f32 %v2275_v24, %v3370_v50  ;;  %v2281_v0 = vmul.f32 %v2279_v1, %v3372_v51  ;;  %v3704_v29 = vld [vmem:[#allocation12_spill] sm:$0xff] }
 0x54c   :  { %2243 = vst [vmem:[#allocation7 + $0x18] sm:$0xff] %v2227_v14  ;;  %2245 = vst [vmem:[#allocation7 + $0x28] sm:$0xff] %v2229_v23  ;;  %v2282_v4 = vmul.f32 %v2275_v24, %v3366_v47  ;;  %v2283_v32 = vmul.f32 %v2279_v1, %v3368_v48  ;;  %v2284_v33 = vmul.f32 %v2275_v24, %v3374_v55 }
 0x54d   :  { %2247 = vst [vmem:[#allocation7 + $0x38] sm:$0xff] %v2231_v19  ;;  %2248 = vst [vmem:[#allocation7 + $0x40] sm:$0xff] %v2232_v35  ;;  %v2285_v11 = vmul.f32 %v2279_v1, %v3376_v56  ;;  %v2286_v52 = vmul.f32 %v2275_v24, %v3382_v60  ;;  %v2287_v50 = vmul.f32 %v2279_v1, %v3384_v61 }
 0x54e   :  { %2249 = vst [vmem:[#allocation7 + $0x48] sm:$0xff] %v2233_v44  ;;  %2250 = vst [vmem:[#allocation7 + $0x50] sm:$0xff] %v2234_v5  ;;  %v2288_v51 = vmul.f32 %v2275_v24, %v3406_v12  ;;  %v2289_v47 = vmul.f32 %v2279_v1, %v3408_v13  ;;  %v2290_v48 = vmul.f32 %v2275_v24, %v3410_v17 }
 0x54f   :  { %2251 = vst [vmem:[#allocation7 + $0x58] sm:$0xff] %v2235_v16  ;;  %2252 = vst [vmem:[#allocation7 + $0x60] sm:$0xff] %v2236_v7  ;;  %v2291_v57 = vmul.f32 %v2279_v1, %v3412_v18  ;;  %v2292_v55 = vmul.f32 %v2275_v24, %v3703_v2  ;;  %v2293_v56 = vmul.f32 %v2279_v1, %v3704_v29 }
 0x550   :  { %2253 = vst [vmem:[#allocation7 + $0x68] sm:$0xff] %v2237_v20  ;;  %2254 = vst [vmem:[#allocation7 + $0x70] sm:$0xff] %v2238_v27  ;;  %v2294_v60 = vmul.f32 %v2275_v24, %v3705_v46  ;;  %v2295_v61 = vmul.f32 %v2279_v1, %v3706_v41 }
 0x551   :  { %2255 = vst [vmem:[#allocation7 + $0x78] sm:$0xff] %v2239_v30  ;;  %2296 = vst [vmem:[#allocation7 + $0x80] sm:$0xff] %v2280_v53 }
 0x552   :  { %2297 = vst [vmem:[#allocation7 + $0x88] sm:$0xff] %v2281_v0  ;;  %2298 = vst [vmem:[#allocation7 + $0x90] sm:$0xff] %v2282_v4 }
 0x553   :  { %2299 = vst [vmem:[#allocation7 + $0x98] sm:$0xff] %v2283_v32  ;;  %2300 = vst [vmem:[#allocation7 + $0xa0] sm:$0xff] %v2284_v33 }
 0x554   :  { %2301 = vst [vmem:[#allocation7 + $0xa8] sm:$0xff] %v2285_v11  ;;  %2302 = vst [vmem:[#allocation7 + $0xb0] sm:$0xff] %v2286_v52 }
 0x555   :  { %2303 = vst [vmem:[#allocation7 + $0xb8] sm:$0xff] %v2287_v50  ;;  %2304 = vst [vmem:[#allocation7 + $0xc0] sm:$0xff] %v2288_v51 }
 0x556   :  { %2305 = vst [vmem:[#allocation7 + $0xc8] sm:$0xff] %v2289_v47  ;;  %2306 = vst [vmem:[#allocation7 + $0xd0] sm:$0xff] %v2290_v48 }
 0x557   :  { %2307 = vst [vmem:[#allocation7 + $0xd8] sm:$0xff] %v2291_v57  ;;  %2308 = vst [vmem:[#allocation7 + $0xe0] sm:$0xff] %v2292_v55 }
 0x558   :  { %2309 = vst [vmem:[#allocation7 + $0xe8] sm:$0xff] %v2293_v56  ;;  %2310 = vst [vmem:[#allocation7 + $0xf0] sm:$0xff] %v2294_v60 }
 0x559   :  { %2311 = vst [vmem:[#allocation7 + $0xf8] sm:$0xff] %v2295_v61 }
 0x55a   :  { %2978 = shalt.err (!%p2975_p3)
}
 0x55b   :  { %s2979_s27 = scalar_lea.hbm %s3680_s4, 4096 }
 0x55c   :  { %p2980_p4 = scmp.ne.s32.totalorder %s3680_s4, %s2979_s27  ;;  %p2983_p5 = scmp.lt.u32.totalorder %s2979_s27, %s3680_s4 }
 0x55e   :  { %p2985_p6 = pnand %p2983_p5, %p2980_p4 }
 0x560   :  { %2988 = shalt.err (!%p2985_p6)
}
 0x561   :  { %2323 = dma.vmem_to_hbm [thread:$0]  %s2318_s24, 4096, %s3680_s4, [#allocation4], %s2996_s3, %s2996_s3, %s2997_s28  }
 0x562   :  { %2993 = dma.done.wait [#allocation4], 4096  }
 0x563   :  { %2994 = vsyncadd [#allocation4], 4294963200 }
 0x564   :  { %2327 = vsyncpa [#allocation3], 1 }
 0x565   :  { %2328 = vsyncpa [#allocation4], 1 }
 0x566   :  { %2329 = vsyncpa [#allocation5], 1 }

</bundles_post_ra>
